<compile_context>
chip_gen: v7x
topology: tpu7x:2x2x1
jax: 0.10.0
libtpu: 0.0.40
codegen_flags: <defaults>
</compile_context>

<pallas_src>
import functools

import jax
import jax.numpy as jnp
import numpy as np
from jax import lax
from jax.experimental import pallas as pl
from jax.experimental.pallas import tpu as pltpu


def _poscnn_kernel(x_ref, w_ref, b_ref, o_ref, *, H, W, C, BT):
    """Fused depthwise 3x3 conv + bias + residual on a (BT, H, W*C) block.

    x_ref : (BT, H, W*C)  activation block, native dtype (lane-dense)
    w_ref : (9,  W*C)     per-tap weights, pre-tiled across W, f32
    b_ref : (1,  W*C)     bias, pre-tiled across W, f32
    o_ref : (BT, H, W*C)  output block, native dtype
    """
    WC = W * C
    f32 = jnp.float32

    # Boundary-validity masks, hoisted once per grid step (shared by all BT
    # slabs).  They zero the wrap-around produced by the circular rolls, which
    # reproduces the conv's 1-pixel zero padding without any halo buffer.
    lane = lax.broadcasted_iota(jnp.int32, (H, WC), 1)
    row = lax.broadcasted_iota(jnp.int32, (H, WC), 0)
    has_left = lane >= C              # source column w-1 exists
    has_right = lane < (WC - C)       # source column w+1 exists
    has_up = row >= 1                 # source row    h-1 exists
    has_down = row < (H - 1)          # source row    h+1 exists

    for b in range(BT):
        # Upcast once to f32; accumulate in f32, store back in native dtype.
        xf = x_ref[b].astype(f32)                     # (H, W*C)
        # Residual + bias folded into the accumulator init.
        acc = xf + b_ref[...]

        for dy in range(3):
            r = dy - 1                                # source row offset
            if r == 0:
                rows = xf
            elif r == -1:                             # source row h-1
                rows = jnp.where(has_up, pltpu.roll(xf, 1, 0), 0.0)
            else:                                     # source row h+1
                rows = jnp.where(has_down, pltpu.roll(xf, H - 1, 0), 0.0)

            for dx in range(3):
                co = dx - 1                           # source column offset
                if co == 0:
                    tap = rows
                elif co == -1:                        # source column w-1
                    tap = jnp.where(has_left, pltpu.roll(rows, C, 1), 0.0)
                else:                                 # source column w+1
                    tap = jnp.where(has_right, pltpu.roll(rows, WC - C, 1), 0.0)

                k = dy * 3 + dx
                # Per-tap weight-row read keeps weight live ranges short
                # (only the current dy's rows need to stay in vregs).
                acc = acc + tap * w_ref[k:k + 1, :]

        o_ref[b] = acc.astype(o_ref.dtype)


def prepare_poscnn_params(w, b, W):
    """Pre-tile depthwise weights/bias across W for the lane-dense (W*C) axis.

    Done ONCE per parameter set (hoisted out of the per-call path).
    w: (3, 3, C) depthwise taps, b: (C,).  Returns small f32 arrays
    (9, W*C) and (1, W*C).
    """
    C = w.shape[-1]
    WC = W * C
    w_wc = jnp.broadcast_to(
        w.astype(jnp.float32).reshape(3, 3, 1, C), (3, 3, W, C)
    ).reshape(9, WC)
    b_wc = jnp.broadcast_to(b.astype(jnp.float32), (W, C)).reshape(1, WC)
    return {"w_wc": w_wc, "b_wc": b_wc}


@functools.partial(jax.jit, static_argnums=(1, 2))
def pos_cnn_forward(x, H, W, prepared):
    """PosCNN forward (s=1). x: (B, N, C) with N == H*W. Returns (B, N, C) in x.dtype."""
    B, N, C = x.shape
    assert N == H * W
    WC = W * C
    # Lane-dense output requirement: keep stores as unmasked full-lane vst.
    assert WC % 128 == 0, "W*C must be a multiple of 128 for lane-dense stores"

    # Free contiguous reinterpretation: (B, N, C) == (B, H, W, C) == (B, H, W*C).
    # NOTE: no dtype cast here -- native-dtype I/O (bf16 stays bf16).
    x_l = x.reshape(B, H, WC)

    # Batch-tile size: amortize per-grid-step overhead by moving >= ~512 KiB
    # per step when B allows it (always at least one image per step).
    per_image = H * WC * x.dtype.itemsize
    target = 512 * 1024
    BT = 1
    for cand in range(1, B + 1):
        if B % cand == 0 and cand * per_image <= max(target, per_image):
            BT = cand

    out = pl.pallas_call(
        functools.partial(_poscnn_kernel, H=H, W=W, C=C, BT=BT),
        grid=(B // BT,),
        in_specs=[
            pl.BlockSpec((BT, H, WC), lambda i: (i, 0, 0)),
            pl.BlockSpec((9, WC), lambda i: (0, 0)),
            pl.BlockSpec((1, WC), lambda i: (0, 0)),
        ],
        out_specs=pl.BlockSpec((BT, H, WC), lambda i: (i, 0, 0)),
        out_shape=jax.ShapeDtypeStruct((B, H, WC), x.dtype),
        compiler_params=pltpu.CompilerParams(
            dimension_semantics=("parallel",)),
    )(x_l, prepared["w_wc"], prepared["b_wc"])

    return out.reshape(B, N, C)


def reference_forward(x, H, W, params):
    """Pure-JAX reference: depthwise 3x3 conv (pad 1) + bias + residual, f32."""
    B, N, C = x.shape
    img = x.reshape(B, H, W, C).astype(jnp.float32)
    pad = jnp.pad(img, ((0, 0), (1, 1), (1, 1), (0, 0)))
    out = jnp.zeros_like(img)
    for dy in range(3):
        for dx in range(3):
            out = out + pad[:, dy:dy + H, dx:dx + W, :] * params["w"][dy, dx]
    out = out + params["b"] + img
    return out.reshape(B, N, C)


if __name__ == "__main__":
    B, H, W, C = 2, 16, 16, 32          # embed_dim = in_chans = 32 (depthwise)
    N = H * W

    key = jax.random.PRNGKey(0)
    k1, k2, k3 = jax.random.split(key, 3)
    params = {
        "w": jax.random.normal(k1, (3, 3, C), jnp.float32) * 0.1,
        "b": jax.random.normal(k2, (C,), jnp.float32) * 0.1,
    }
    prepared = prepare_poscnn_params(params["w"], params["b"], W)
    x = jax.random.normal(k3, (B, N, C), jnp.float32)

    # f32 path (matches the PyTorch module's default dtype).
    out = jax.block_until_ready(pos_cnn_forward(x, H, W, prepared))
    ref = jax.block_until_ready(reference_forward(x, H, W, params))
    assert out.shape == (B, N, C) and out.dtype == x.dtype
    np.testing.assert_allclose(np.asarray(out), np.asarray(ref),
                               atol=1e-4, rtol=1e-4)

    # bf16 native-I/O path (f32 accumulate inside the kernel, bf16 in/out).
    x_bf = x.astype(jnp.bfloat16)
    out_bf = jax.block_until_ready(pos_cnn_forward(x_bf, H, W, prepared))
    ref_bf = jax.block_until_ready(reference_forward(x_bf, H, W, params))
    assert out_bf.dtype == jnp.bfloat16
    np.testing.assert_allclose(np.asarray(out_bf.astype(jnp.float32)),
                               np.asarray(ref_bf), atol=1e-1, rtol=1e-1)

    print("KERNEL_OK")
</pallas_src>

<mosaic_0001>
module attributes {stable_mosaic.version = 11 : i64} {
  func.func @_poscnn_kernel(%arg0: i32, %arg1: memref<2x16x512xf32, #tpu.memory_space<vmem>>, %arg2: memref<9x512xf32, #tpu.memory_space<vmem>>, %arg3: memref<1x512xf32, #tpu.memory_space<vmem>>, %arg4: memref<2x16x512xf32, #tpu.memory_space<vmem>>) attributes {dimension_semantics = [#tpu.dimension_semantics<parallel>], iteration_bounds = array<i64: 1>, scalar_prefetch = 0 : i64, scratch_operands = 0 : i64, tpu.core_type = #tpu.core_type<tc>, window_params = [{transform_indices = @transform_0, window_bounds = array<i64: 2, 16, 512>}, {pipeline_mode = #tpu.pipeline_mode<synchronous>, transform_indices = @transform_1, window_bounds = array<i64: 9, 512>}, {pipeline_mode = #tpu.pipeline_mode<synchronous>, transform_indices = @transform_2, window_bounds = array<i64: 1, 512>}, {transform_indices = @transform_3, window_bounds = array<i64: 2, 16, 512>}]} {
    %0 = tpu.iota {dimensions = array<i32: 1>} : vector<16x512xi32>
    %1 = tpu.iota {dimensions = array<i32: 0>} : vector<16x512xi32>
    %c32_i32 = arith.constant 32 : i32
    %2 = vector.broadcast %c32_i32 : i32 to vector<16x512xi32>
    %3 = arith.cmpi sge, %0, %2 : vector<16x512xi32>
    %c480_i32 = arith.constant 480 : i32
    %4 = vector.broadcast %c480_i32 : i32 to vector<16x512xi32>
    %5 = arith.cmpi slt, %0, %4 : vector<16x512xi32>
    %c1_i32 = arith.constant 1 : i32
    %6 = vector.broadcast %c1_i32 : i32 to vector<16x512xi32>
    %7 = arith.cmpi sge, %1, %6 : vector<16x512xi32>
    %c15_i32 = arith.constant 15 : i32
    %8 = vector.broadcast %c15_i32 : i32 to vector<16x512xi32>
    %9 = arith.cmpi slt, %1, %8 : vector<16x512xi32>
    %c0 = arith.constant 0 : index
    %c0_0 = arith.constant 0 : index
    %c0_1 = arith.constant 0 : index
    %10 = vector.load %arg1[%c0, %c0_0, %c0_1] : memref<2x16x512xf32, #tpu.memory_space<vmem>>, vector<1x16x512xf32>
    %11 = vector.shape_cast %10 : vector<1x16x512xf32> to vector<16x512xf32>
    %c0_2 = arith.constant 0 : index
    %c0_3 = arith.constant 0 : index
    %12 = vector.load %arg3[%c0_2, %c0_3] : memref<1x512xf32, #tpu.memory_space<vmem>>, vector<1x512xf32>
    %13 = vector.broadcast %12 : vector<1x512xf32> to vector<16x512xf32>
    %14 = arith.addf %11, %13 : vector<16x512xf32>
    %c1_i32_4 = arith.constant 1 : i32
    %15 = tpu.dynamic_rotate %11 by %c1_i32_4 dim 0 : vector<16x512xf32>, i32 -> vector<16x512xf32>
    %cst = arith.constant 0.000000e+00 : f32
    %16 = vector.broadcast %cst : f32 to vector<16x512xf32>
    %17 = arith.select %7, %15, %16 : vector<16x512xi1>, vector<16x512xf32>
    %c32_i32_5 = arith.constant 32 : i32
    %18 = tpu.dynamic_rotate %17 by %c32_i32_5 dim 1 : vector<16x512xf32>, i32 -> vector<16x512xf32>
    %cst_6 = arith.constant 0.000000e+00 : f32
    %19 = vector.broadcast %cst_6 : f32 to vector<16x512xf32>
    %20 = arith.select %3, %18, %19 : vector<16x512xi1>, vector<16x512xf32>
    %c0_7 = arith.constant 0 : index
    %c0_8 = arith.constant 0 : index
    %21 = vector.load %arg2[%c0_7, %c0_8] : memref<9x512xf32, #tpu.memory_space<vmem>>, vector<1x512xf32>
    %22 = vector.broadcast %21 : vector<1x512xf32> to vector<16x512xf32>
    %23 = arith.mulf %20, %22 : vector<16x512xf32>
    %24 = arith.addf %14, %23 : vector<16x512xf32>
    %c1 = arith.constant 1 : index
    %c0_9 = arith.constant 0 : index
    %25 = vector.load %arg2[%c1, %c0_9] : memref<9x512xf32, #tpu.memory_space<vmem>>, vector<1x512xf32>
    %26 = vector.broadcast %25 : vector<1x512xf32> to vector<16x512xf32>
    %27 = arith.mulf %17, %26 : vector<16x512xf32>
    %28 = arith.addf %24, %27 : vector<16x512xf32>
    %c480_i32_10 = arith.constant 480 : i32
    %29 = tpu.dynamic_rotate %17 by %c480_i32_10 dim 1 : vector<16x512xf32>, i32 -> vector<16x512xf32>
    %cst_11 = arith.constant 0.000000e+00 : f32
    %30 = vector.broadcast %cst_11 : f32 to vector<16x512xf32>
    %31 = arith.select %5, %29, %30 : vector<16x512xi1>, vector<16x512xf32>
    %c2 = arith.constant 2 : index
    %c0_12 = arith.constant 0 : index
    %32 = vector.load %arg2[%c2, %c0_12] : memref<9x512xf32, #tpu.memory_space<vmem>>, vector<1x512xf32>
    %33 = vector.broadcast %32 : vector<1x512xf32> to vector<16x512xf32>
    %34 = arith.mulf %31, %33 : vector<16x512xf32>
    %35 = arith.addf %28, %34 : vector<16x512xf32>
    %c32_i32_13 = arith.constant 32 : i32
    %36 = tpu.dynamic_rotate %11 by %c32_i32_13 dim 1 : vector<16x512xf32>, i32 -> vector<16x512xf32>
    %cst_14 = arith.constant 0.000000e+00 : f32
    %37 = vector.broadcast %cst_14 : f32 to vector<16x512xf32>
    %38 = arith.select %3, %36, %37 : vector<16x512xi1>, vector<16x512xf32>
    %c3 = arith.constant 3 : index
    %c0_15 = arith.constant 0 : index
    %39 = vector.load %arg2[%c3, %c0_15] : memref<9x512xf32, #tpu.memory_space<vmem>>, vector<1x512xf32>
    %40 = vector.broadcast %39 : vector<1x512xf32> to vector<16x512xf32>
    %41 = arith.mulf %38, %40 : vector<16x512xf32>
    %42 = arith.addf %35, %41 : vector<16x512xf32>
    %c4 = arith.constant 4 : index
    %c0_16 = arith.constant 0 : index
    %43 = vector.load %arg2[%c4, %c0_16] : memref<9x512xf32, #tpu.memory_space<vmem>>, vector<1x512xf32>
    %44 = vector.broadcast %43 : vector<1x512xf32> to vector<16x512xf32>
    %45 = arith.mulf %11, %44 : vector<16x512xf32>
    %46 = arith.addf %42, %45 : vector<16x512xf32>
    %c480_i32_17 = arith.constant 480 : i32
    %47 = tpu.dynamic_rotate %11 by %c480_i32_17 dim 1 : vector<16x512xf32>, i32 -> vector<16x512xf32>
    %cst_18 = arith.constant 0.000000e+00 : f32
    %48 = vector.broadcast %cst_18 : f32 to vector<16x512xf32>
    %49 = arith.select %5, %47, %48 : vector<16x512xi1>, vector<16x512xf32>
    %c5 = arith.constant 5 : index
    %c0_19 = arith.constant 0 : index
    %50 = vector.load %arg2[%c5, %c0_19] : memref<9x512xf32, #tpu.memory_space<vmem>>, vector<1x512xf32>
    %51 = vector.broadcast %50 : vector<1x512xf32> to vector<16x512xf32>
    %52 = arith.mulf %49, %51 : vector<16x512xf32>
    %53 = arith.addf %46, %52 : vector<16x512xf32>
    %c15_i32_20 = arith.constant 15 : i32
    %54 = tpu.dynamic_rotate %11 by %c15_i32_20 dim 0 : vector<16x512xf32>, i32 -> vector<16x512xf32>
    %cst_21 = arith.constant 0.000000e+00 : f32
    %55 = vector.broadcast %cst_21 : f32 to vector<16x512xf32>
    %56 = arith.select %9, %54, %55 : vector<16x512xi1>, vector<16x512xf32>
    %c32_i32_22 = arith.constant 32 : i32
    %57 = tpu.dynamic_rotate %56 by %c32_i32_22 dim 1 : vector<16x512xf32>, i32 -> vector<16x512xf32>
    %cst_23 = arith.constant 0.000000e+00 : f32
    %58 = vector.broadcast %cst_23 : f32 to vector<16x512xf32>
    %59 = arith.select %3, %57, %58 : vector<16x512xi1>, vector<16x512xf32>
    %c6 = arith.constant 6 : index
    %c0_24 = arith.constant 0 : index
    %60 = vector.load %arg2[%c6, %c0_24] : memref<9x512xf32, #tpu.memory_space<vmem>>, vector<1x512xf32>
    %61 = vector.broadcast %60 : vector<1x512xf32> to vector<16x512xf32>
    %62 = arith.mulf %59, %61 : vector<16x512xf32>
    %63 = arith.addf %53, %62 : vector<16x512xf32>
    %c7 = arith.constant 7 : index
    %c0_25 = arith.constant 0 : index
    %64 = vector.load %arg2[%c7, %c0_25] : memref<9x512xf32, #tpu.memory_space<vmem>>, vector<1x512xf32>
    %65 = vector.broadcast %64 : vector<1x512xf32> to vector<16x512xf32>
    %66 = arith.mulf %56, %65 : vector<16x512xf32>
    %67 = arith.addf %63, %66 : vector<16x512xf32>
    %c480_i32_26 = arith.constant 480 : i32
    %68 = tpu.dynamic_rotate %56 by %c480_i32_26 dim 1 : vector<16x512xf32>, i32 -> vector<16x512xf32>
    %cst_27 = arith.constant 0.000000e+00 : f32
    %69 = vector.broadcast %cst_27 : f32 to vector<16x512xf32>
    %70 = arith.select %5, %68, %69 : vector<16x512xi1>, vector<16x512xf32>
    %c8 = arith.constant 8 : index
    %c0_28 = arith.constant 0 : index
    %71 = vector.load %arg2[%c8, %c0_28] : memref<9x512xf32, #tpu.memory_space<vmem>>, vector<1x512xf32>
    %72 = vector.broadcast %71 : vector<1x512xf32> to vector<16x512xf32>
    %73 = arith.mulf %70, %72 : vector<16x512xf32>
    %74 = arith.addf %67, %73 : vector<16x512xf32>
    %c0_29 = arith.constant 0 : index
    %c0_30 = arith.constant 0 : index
    %c0_31 = arith.constant 0 : index
    %75 = vector.load %arg4[%c0_29, %c0_30, %c0_31] : memref<2x16x512xf32, #tpu.memory_space<vmem>>, vector<1x16x512xf32>
    %76 = vector.shape_cast %75 : vector<1x16x512xf32> to vector<16x512xf32>
    %77 = vector.shape_cast %74 : vector<16x512xf32> to vector<1x16x512xf32>
    tpu.vector_store %arg4[%c0_29, %c0_30, %c0_31], %77 {strides = array<i32>} : memref<2x16x512xf32, #tpu.memory_space<vmem>>, vector<1x16x512xf32>,
    %c1_32 = arith.constant 1 : index
    %c0_33 = arith.constant 0 : index
    %c0_34 = arith.constant 0 : index
    %78 = vector.load %arg1[%c1_32, %c0_33, %c0_34] : memref<2x16x512xf32, #tpu.memory_space<vmem>>, vector<1x16x512xf32>
    %79 = vector.shape_cast %78 : vector<1x16x512xf32> to vector<16x512xf32>
    %c0_35 = arith.constant 0 : index
    %c0_36 = arith.constant 0 : index
    %80 = vector.load %arg3[%c0_35, %c0_36] : memref<1x512xf32, #tpu.memory_space<vmem>>, vector<1x512xf32>
    %81 = vector.broadcast %80 : vector<1x512xf32> to vector<16x512xf32>
    %82 = arith.addf %79, %81 : vector<16x512xf32>
    %c1_i32_37 = arith.constant 1 : i32
    %83 = tpu.dynamic_rotate %79 by %c1_i32_37 dim 0 : vector<16x512xf32>, i32 -> vector<16x512xf32>
    %cst_38 = arith.constant 0.000000e+00 : f32
    %84 = vector.broadcast %cst_38 : f32 to vector<16x512xf32>
    %85 = arith.select %7, %83, %84 : vector<16x512xi1>, vector<16x512xf32>
    %c32_i32_39 = arith.constant 32 : i32
    %86 = tpu.dynamic_rotate %85 by %c32_i32_39 dim 1 : vector<16x512xf32>, i32 -> vector<16x512xf32>
    %cst_40 = arith.constant 0.000000e+00 : f32
    %87 = vector.broadcast %cst_40 : f32 to vector<16x512xf32>
    %88 = arith.select %3, %86, %87 : vector<16x512xi1>, vector<16x512xf32>
    %c0_41 = arith.constant 0 : index
    %c0_42 = arith.constant 0 : index
    %89 = vector.load %arg2[%c0_41, %c0_42] : memref<9x512xf32, #tpu.memory_space<vmem>>, vector<1x512xf32>
    %90 = vector.broadcast %89 : vector<1x512xf32> to vector<16x512xf32>
    %91 = arith.mulf %88, %90 : vector<16x512xf32>
    %92 = arith.addf %82, %91 : vector<16x512xf32>
    %c1_43 = arith.constant 1 : index
    %c0_44 = arith.constant 0 : index
    %93 = vector.load %arg2[%c1_43, %c0_44] : memref<9x512xf32, #tpu.memory_space<vmem>>, vector<1x512xf32>
    %94 = vector.broadcast %93 : vector<1x512xf32> to vector<16x512xf32>
    %95 = arith.mulf %85, %94 : vector<16x512xf32>
    %96 = arith.addf %92, %95 : vector<16x512xf32>
    %c480_i32_45 = arith.constant 480 : i32
    %97 = tpu.dynamic_rotate %85 by %c480_i32_45 dim 1 : vector<16x512xf32>, i32 -> vector<16x512xf32>
    %cst_46 = arith.constant 0.000000e+00 : f32
    %98 = vector.broadcast %cst_46 : f32 to vector<16x512xf32>
    %99 = arith.select %5, %97, %98 : vector<16x512xi1>, vector<16x512xf32>
    %c2_47 = arith.constant 2 : index
    %c0_48 = arith.constant 0 : index
    %100 = vector.load %arg2[%c2_47, %c0_48] : memref<9x512xf32, #tpu.memory_space<vmem>>, vector<1x512xf32>
    %101 = vector.broadcast %100 : vector<1x512xf32> to vector<16x512xf32>
    %102 = arith.mulf %99, %101 : vector<16x512xf32>
    %103 = arith.addf %96, %102 : vector<16x512xf32>
    %c32_i32_49 = arith.constant 32 : i32
    %104 = tpu.dynamic_rotate %79 by %c32_i32_49 dim 1 : vector<16x512xf32>, i32 -> vector<16x512xf32>
    %cst_50 = arith.constant 0.000000e+00 : f32
    %105 = vector.broadcast %cst_50 : f32 to vector<16x512xf32>
    %106 = arith.select %3, %104, %105 : vector<16x512xi1>, vector<16x512xf32>
    %c3_51 = arith.constant 3 : index
    %c0_52 = arith.constant 0 : index
    %107 = vector.load %arg2[%c3_51, %c0_52] : memref<9x512xf32, #tpu.memory_space<vmem>>, vector<1x512xf32>
    %108 = vector.broadcast %107 : vector<1x512xf32> to vector<16x512xf32>
    %109 = arith.mulf %106, %108 : vector<16x512xf32>
    %110 = arith.addf %103, %109 : vector<16x512xf32>
    %c4_53 = arith.constant 4 : index
    %c0_54 = arith.constant 0 : index
    %111 = vector.load %arg2[%c4_53, %c0_54] : memref<9x512xf32, #tpu.memory_space<vmem>>, vector<1x512xf32>
    %112 = vector.broadcast %111 : vector<1x512xf32> to vector<16x512xf32>
    %113 = arith.mulf %79, %112 : vector<16x512xf32>
    %114 = arith.addf %110, %113 : vector<16x512xf32>
    %c480_i32_55 = arith.constant 480 : i32
    %115 = tpu.dynamic_rotate %79 by %c480_i32_55 dim 1 : vector<16x512xf32>, i32 -> vector<16x512xf32>
    %cst_56 = arith.constant 0.000000e+00 : f32
    %116 = vector.broadcast %cst_56 : f32 to vector<16x512xf32>
    %117 = arith.select %5, %115, %116 : vector<16x512xi1>, vector<16x512xf32>
    %c5_57 = arith.constant 5 : index
    %c0_58 = arith.constant 0 : index
    %118 = vector.load %arg2[%c5_57, %c0_58] : memref<9x512xf32, #tpu.memory_space<vmem>>, vector<1x512xf32>
    %119 = vector.broadcast %118 : vector<1x512xf32> to vector<16x512xf32>
    %120 = arith.mulf %117, %119 : vector<16x512xf32>
    %121 = arith.addf %114, %120 : vector<16x512xf32>
    %c15_i32_59 = arith.constant 15 : i32
    %122 = tpu.dynamic_rotate %79 by %c15_i32_59 dim 0 : vector<16x512xf32>, i32 -> vector<16x512xf32>
    %cst_60 = arith.constant 0.000000e+00 : f32
    %123 = vector.broadcast %cst_60 : f32 to vector<16x512xf32>
    %124 = arith.select %9, %122, %123 : vector<16x512xi1>, vector<16x512xf32>
    %c32_i32_61 = arith.constant 32 : i32
    %125 = tpu.dynamic_rotate %124 by %c32_i32_61 dim 1 : vector<16x512xf32>, i32 -> vector<16x512xf32>
    %cst_62 = arith.constant 0.000000e+00 : f32
    %126 = vector.broadcast %cst_62 : f32 to vector<16x512xf32>
    %127 = arith.select %3, %125, %126 : vector<16x512xi1>, vector<16x512xf32>
    %c6_63 = arith.constant 6 : index
    %c0_64 = arith.constant 0 : index
    %128 = vector.load %arg2[%c6_63, %c0_64] : memref<9x512xf32, #tpu.memory_space<vmem>>, vector<1x512xf32>
    %129 = vector.broadcast %128 : vector<1x512xf32> to vector<16x512xf32>
    %130 = arith.mulf %127, %129 : vector<16x512xf32>
    %131 = arith.addf %121, %130 : vector<16x512xf32>
    %c7_65 = arith.constant 7 : index
    %c0_66 = arith.constant 0 : index
    %132 = vector.load %arg2[%c7_65, %c0_66] : memref<9x512xf32, #tpu.memory_space<vmem>>, vector<1x512xf32>
    %133 = vector.broadcast %132 : vector<1x512xf32> to vector<16x512xf32>
    %134 = arith.mulf %124, %133 : vector<16x512xf32>
    %135 = arith.addf %131, %134 : vector<16x512xf32>
    %c480_i32_67 = arith.constant 480 : i32
    %136 = tpu.dynamic_rotate %124 by %c480_i32_67 dim 1 : vector<16x512xf32>, i32 -> vector<16x512xf32>
    %cst_68 = arith.constant 0.000000e+00 : f32
    %137 = vector.broadcast %cst_68 : f32 to vector<16x512xf32>
    %138 = arith.select %5, %136, %137 : vector<16x512xi1>, vector<16x512xf32>
    %c8_69 = arith.constant 8 : index
    %c0_70 = arith.constant 0 : index
    %139 = vector.load %arg2[%c8_69, %c0_70] : memref<9x512xf32, #tpu.memory_space<vmem>>, vector<1x512xf32>
    %140 = vector.broadcast %139 : vector<1x512xf32> to vector<16x512xf32>
    %141 = arith.mulf %138, %140 : vector<16x512xf32>
    %142 = arith.addf %135, %141 : vector<16x512xf32>
    %c1_71 = arith.constant 1 : index
    %c0_72 = arith.constant 0 : index
    %c0_73 = arith.constant 0 : index
    %143 = vector.load %arg4[%c1_71, %c0_72, %c0_73] : memref<2x16x512xf32, #tpu.memory_space<vmem>>, vector<1x16x512xf32>
    %144 = vector.shape_cast %143 : vector<1x16x512xf32> to vector<16x512xf32>
    %145 = vector.shape_cast %142 : vector<16x512xf32> to vector<1x16x512xf32>
    tpu.vector_store %arg4[%c1_71, %c0_72, %c0_73], %145 {strides = array<i32>} : memref<2x16x512xf32, #tpu.memory_space<vmem>>, vector<1x16x512xf32>,
    return
  }
  func.func @transform_0(%arg0: i32) -> (i32, i32, i32) {
    %c0_i32 = arith.constant 0 : i32
    %c0_i32_0 = arith.constant 0 : i32
    %c0_i32_1 = arith.constant 0 : i32
    return %arg0, %c0_i32, %c0_i32_0 : i32, i32, i32
  }
  func.func @transform_1(%arg0: i32) -> (i32, i32) {
    %c0_i32 = arith.constant 0 : i32
    %c0_i32_0 = arith.constant 0 : i32
    %c0_i32_1 = arith.constant 0 : i32
    return %c0_i32, %c0_i32_0 : i32, i32
  }
  func.func @transform_2(%arg0: i32) -> (i32, i32) {
    %c0_i32 = arith.constant 0 : i32
    %c0_i32_0 = arith.constant 0 : i32
    %c0_i32_1 = arith.constant 0 : i32
    return %c0_i32, %c0_i32_0 : i32, i32
  }
  func.func @transform_3(%arg0: i32) -> (i32, i32, i32) {
    %c0_i32 = arith.constant 0 : i32
    %c0_i32_0 = arith.constant 0 : i32
    %c0_i32_1 = arith.constant 0 : i32
    return %arg0, %c0_i32, %c0_i32_0 : i32, i32, i32
  }
}

</mosaic_0001>

<bundles_post_ra>
// kernel: pos_cnn_forward.1
= control target key start
LH: loop header
LB: loop body
LE: loop exit
PB: predicated region body
PF: predicated region fallthrough
CT: control target
= control target key end

     0   :  { %v14_v0 = vlaneseq  ;;  %s1350_s26 = smov 32   ;;  %s1351_s14 = smov 96   ;;  %s2811_s0 = inlined_call_operand.vmem [shape: f32[2,16,512], index: 0, kind: input, shape index: {}]   ;;  %s2812_s2 = inlined_call_operand.vmem [shape: f32[1,512], index: 2, kind: input, shape index: {}]   ;;  %s2813_s1 = inlined_call_operand.vmem [shape: f32[9,512], index: 1, kind: input, shape index: {}]   ;;  %s2814_s3 = inlined_call_operand.vmem [shape: f32[2,16,512], index: 3, kind: output, shape index: {}]  }
   0x1   :  { %v1375_v1 = vld [vmem:[%s2811_s0 + $0x8] sm:$0xff]  ;;  %v1390_v6 = vld [vmem:[%s2811_s0] sm:$0xff]  ;;  %v1400_v8 = vld [vmem:[%s2811_s0 + $0x10] sm:$0xff] }
   0x2   :  { %v1380_v2 = vld [vmem:[%s2811_s0 + $0x28] sm:$0xff]  ;;  %v1383_v3 = vshrl.u32 %v14_v0, 7  ;;  %v73_v4 = vrot.slane %v1375_v1, 7  ;;  %v1395_v7 = vld [vmem:[%s2811_s0 + $0x20] sm:$0xff]  ;;  %v72_v9 = vrot.slane %v1390_v6, 7  ;;  %v1409_v11 = vld [vmem:[%s2811_s0 + $0x30] sm:$0xff] }
   0x3   :  { %v77_v5 = vrot.slane %v1380_v2, 7  ;;  %v76_v10 = vrot.slane %v1395_v7, 7  ;;  %v74_v12 = vrot.slane %v1400_v8, 7  ;;  %v1427_v17 = vld [vmem:[%s2811_s0 + $0x18] sm:$0xff]  ;;  %v78_v21 = vrot.slane %v1409_v11, 7  ;;  %v1493_v36 = vld [vmem:[%s2811_s0 + $0x40] sm:$0xff] }
   0x4   :  { %vm80_vm0 = vcmp.lt.s32.totalorder %v1383_v3, 1  ;;  %vm30_vm1 = vcmp.ge.s32.totalorder %v1383_v3, 1  ;;  %v1436_v18 = vld [vmem:[%s2811_s0 + $0x38] sm:$0xff]  ;;  %v75_v22 = vrot.slane %v1427_v17, 7  ;;  %v461_v28 = vrot.slane %v1375_v1, 1  ;;  %v1506_v39 = vld [vmem:[%s2811_s0 + $0x60] sm:$0xff] }
   0x5   :  { %v1414_v13 = vsel %vm80_vm0, %v73_v4, %v77_v5  ;;  %v1418_v14 = vsel %vm80_vm0, %v72_v9, %v76_v10  ;;  %v86_v15 = vsel %vm80_vm0, %v77_v5, %v73_v4  ;;  %v85_v16 = vsel %vm80_vm0, %v76_v10, %v72_v9  ;;  %v1511_v40 = vld [vmem:[%s2811_s0 + $0x48] sm:$0xff]  ;;  %v1528_v45 = vld [vmem:[%s2811_s0 + $0x50] sm:$0xff]  ;;  %v1560_v54 = vld [vmem:[%s2811_s0 + $0x58] sm:$0xff] }
   0x6   :  { %103 = vrot.lane.b32.xlu1 %v1414_v13, %s1350_s26  ;;  %99 = vrot.lane.b32.xlu0 %v1418_v14, %s1350_s26  ;;  %v1440_v19 = vsel %vm30_vm1, %v86_v15, 0.0  ;;  %v1444_v20 = vsel %vm30_vm1, %v85_v16, 0.0  ;;  %v87_v23 = vsel %vm80_vm0, %v78_v21, %v74_v12  ;;  %v79_v24 = vrot.slane %v1436_v18, 7  ;;  %v1516_v41 = vld [vmem:[%s2811_s0 + $0x68] sm:$0xff]  ;;  %v1544_v51 = vld [vmem:[%s2811_s0 + $0x70] sm:$0xff] }
   0x7   :  { %v1457_v25 = vsel %vm80_vm0, %v74_v12, %v78_v21  ;;  %v1461_v26 = vsel %vm30_vm1, %v87_v23, 0.0  ;;  %v465_v30 = vrot.slane %v1380_v2, 1  ;;  %vm468_vm2 = vcmp.lt.s32.totalorder %v1383_v3, 7  ;;  %v1565_v55 = vld [vmem:[%s2811_s0 + $0x78] sm:$0xff] }
   0x8   :  { %v88_v27 = vsel %vm80_vm0, %v79_v24, %v75_v22  ;;  %v1472_v29 = vsel %vm80_vm0, %v75_v22, %v79_v24  ;;  %v462_v32 = vrot.slane %v1400_v8, 1  ;;  %v466_v33 = vrot.slane %v1409_v11, 1 }
   0x9   :  { %v1477_v31 = vsel %vm30_vm1, %v88_v27, 0.0  ;;  %v1484_v34 = vsel %vm468_vm2, %v465_v30, %v461_v28  ;;  %v1488_v35 = vsel %vm468_vm2, %v461_v28, %v465_v30  ;;  %v463_v42 = vrot.slane %v1427_v17, 1 }
   0xa   :  { %101 = vrot.lane.b32.xlu1 %v1440_v19, %s1350_s26  ;;  %97 = vrot.lane.b32.xlu0 %v1444_v20, %s1350_s26  ;;  %2862 = vst [vmem:[#allocation2_spill] sm:$0xff] %v1488_v35  ;;  %v1497_v37 = vsel %vm468_vm2, %v466_v33, %v462_v32  ;;  %v1501_v38 = vsel %vm468_vm2, %v462_v32, %v466_v33  ;;  %v467_v43 = vrot.slane %v1436_v18, 1  ;;  %v713_v44 = vrot.slane %v1493_v36, 7 }
   0xb   :  { %2863 = vst [vmem:[#allocation3_spill] sm:$0xff] %v1501_v38  ;;  %v717_v46 = vrot.slane %v1506_v39, 7  ;;  %v714_v47 = vrot.slane %v1511_v40, 7  ;;  %v718_v48 = vrot.slane %v1516_v41, 7  ;;  %v715_v53 = vrot.slane %v1528_v45, 7 }
   0xc   :  { %v1535_v49 = vsel %vm468_vm2, %v467_v43, %v463_v42  ;;  %v1539_v50 = vsel %vm468_vm2, %v463_v42, %v467_v43  ;;  %v719_v58 = vrot.slane %v1544_v51, 7  ;;  %v716_v60 = vrot.slane %v1560_v54, 7 }
   0xd   :  { %2864 = vst [vmem:[#allocation4_spill] sm:$0xff] %v1539_v50  ;;  %v725_v52 = vsel %vm80_vm0, %v717_v46, %v713_v44  ;;  %v726_v57 = vsel %vm80_vm0, %v718_v48, %v714_v47  ;;  %v720_v61 = vrot.slane %v1565_v55, 7  ;;  %v21_v9 = vadd.s32 8, %v1383_v3 }
   0xe   :  { %107 = vrot.lane.b32.xlu1 %v1457_v25, %s1350_s26  ;;  %105 = vrot.lane.b32.xlu0 %v1461_v26, %s1350_s26  ;;  %v1569_v56 = vsel %vm30_vm1, %v725_v52, 0.0  ;;  %v1580_v59 = vsel %vm30_vm1, %v726_v57, 0.0  ;;  %v727_v62 = vsel %vm80_vm0, %v719_v58, %v715_v53  ;;  %v2821_v10 = vrot.slane %v1493_v36, 1 }
   0xf   :  { %2865 = vst [vmem:[#allocation5_spill] sm:$0xff] %v1569_v56  ;;  %2866 = vst [vmem:[#allocation6_spill] sm:$0xff] %v1580_v59  ;;  %v1596_v63 = vsel %vm30_vm1, %v727_v62, 0.0  ;;  %v728_v4 = vsel %vm80_vm0, %v720_v61, %v716_v60  ;;  %v2822_v12 = vrot.slane %v1506_v39, 1  ;;  %vm33_vm3 = vcmp.lt.s32.totalorder %v21_v9, 15 }
  0x10   :  { %2867 = vst [vmem:[#allocation7_spill] sm:$0xff] %v1596_v63  ;;  %v1606_v5 = vsel %vm30_vm1, %v728_v4, 0.0  ;;  %v2819_v16 = vrot.slane %v1560_v54, 1  ;;  %v2820_v21 = vrot.slane %v1565_v55, 1  ;;  %v2817_v27 = vrot.slane %v1511_v40, 1 }
  0x11   :  { %2868 = vst [vmem:[#allocation8_spill] sm:$0xff] %v1606_v5  ;;  %v1105_v15 = vsel %vm468_vm2, %v2822_v12, %v2821_v10  ;;  %v2818_v28 = vrot.slane %v1516_v41, 1  ;;  %v2815_v33 = vrot.slane %v1528_v45, 1  ;;  %v2816_v42 = vrot.slane %v1544_v51, 1 }
  0x12   :  { %111 = vrot.lane.b32.xlu1 %v1472_v29, %s1350_s26  ;;  %109 = vrot.lane.b32.xlu0 %v1477_v31, %s1350_s26  ;;  %v1632_v22 = vsel %vm33_vm3, %v1105_v15, 0.0  ;;  %v1108_v23 = vsel %vm468_vm2, %v2820_v21, %v2819_v16  ;;  %v460_v57 = vrot.slane %v1390_v6, 1  ;;  %v464_v62 = vrot.slane %v1395_v7, 1 }
  0x13   :  { %v1645_v24 = vsel %vm33_vm3, %v1108_v23, 0.0  ;;  %v1106_v30 = vsel %vm468_vm2, %v2818_v28, %v2817_v27  ;;  %v1107_v43 = vsel %vm468_vm2, %v2816_v42, %v2815_v33  ;;  %v1828_v28 = vsub.s32 3, %v1383_v3 }
  0x14   :  { %v1660_v32 = vsel %vm33_vm3, %v1106_v30, 0.0  ;;  %v1675_v52 = vsel %vm33_vm3, %v1107_v43, 0.0  ;;  %v473_v4 = vsel %vm468_vm2, %v464_v62, %v460_v57  ;;  %v1702_v23 = vsel %vm468_vm2, %v460_v57, %v464_v62 }
  0x15   :  { %2869 = vst [vmem:[#allocation9_spill] sm:$0xff] %v1660_v32  ;;  %2870 = vst [vmem:[#allocation10_spill] sm:$0xff] %v1675_v52  ;;  %v1698_v15 = vsel %vm33_vm3, %v473_v4, 0.0  ;;  %v1710_v30 = vsel %vm33_vm3, %v1484_v34, 0.0  ;;  %v1718_v43 = vsel %vm33_vm3, %v1497_v37, 0.0  ;;  %v1726_v34 = vsel %vm33_vm3, %v1535_v49, 0.0 }
  0x16   :  { %209 = vrot.lane.b32.xlu1 %v1418_v14, %s1351_s14  ;;  %207 = vrot.lane.b32.xlu0 %v1444_v20, %s1351_s14  ;;  %2871 = vst [vmem:[#allocation11_spill] sm:$0xff] %v1698_v15  ;;  %2872 = vst [vmem:[#allocation12_spill] sm:$0xff] %v1702_v23  ;;  %v1754_v37 = vsel %vm80_vm0, %v713_v44, %v717_v46  ;;  %v1766_v49 = vsel %vm80_vm0, %v714_v47, %v718_v48  ;;  %v1793_v47 = vsub.s32 1, %v1383_v3  ;;  %v42_v48 = vld [vmem:[%s2812_s2] sm:$0xf] }
  0x17   :  { %2873 = vst [vmem:[#allocation13_spill] sm:$0xff] %v1710_v30  ;;  %2874 = vst [vmem:[#allocation14_spill] sm:$0xff] %v1718_v43  ;;  %v1778_v44 = vsel %vm80_vm0, %v715_v53, %v719_v58  ;;  %v1790_v46 = vsel %vm80_vm0, %v716_v60, %v720_v61  ;;  %v1803_v53 = vand.u32 127, %v14_v0  ;;  %v1308_v58 = vld [vmem:[%s2813_s1 + $0x1] ss:$8 sm:$0xf] }
  0x18   :  { %2875 = vst [vmem:[#allocation15_spill] sm:$0xff] %v1726_v34  ;;  %2876 = vst [vmem:[#allocation16_spill] sm:$0xff] %v1754_v37  ;;  %v130_v60 = vld [vmem:[%s2813_s1] ss:$8 sm:$0xf]  ;;  %v51_v61 = vrot.slane %v42_v48, %v1793_v47  ;;  %v178_v9 = vrot.slane %v1308_v58, %v1793_v47  ;;  %v1820_v57 = vsub.s32 0, %v1383_v3 }
  0x19   :  { %2877 = vst [vmem:[#allocation17_spill] sm:$0xff] %v1766_v49  ;;  %2878 = vst [vmem:[#allocation18_spill] sm:$0xff] %v1778_v44  ;;  %vm113_vm4 = vcmp.lt.s32.totalorder %v1803_v53, 32  ;;  %v139_v0 = vrot.slane %v130_v60, %v1793_v47  ;;  %v1823_v62 = vsub.s32 2, %v1383_v3  ;;  %vm22_vm5 = vcmp.ge.s32.totalorder %v1803_v53, 32 }
  0x1a   :  { %213 = vrot.lane.b32.xlu1 %v1414_v13, %s1351_s14  ;;  %211 = vrot.lane.b32.xlu0 %v1440_v19, %s1351_s14  ;;  %2879 = vst [vmem:[#allocation19_spill] sm:$0xff] %v1790_v46  ;;  %v69_v33 = vadd.f32 %v51_v61, %v1380_v2  ;;  %v174_v27 = vrot.slane %v1308_v58, %v1820_v57  ;;  %vm223_vm7 = vcmp.lt.s32.totalorder %v1803_v53, 96  ;;  %v1314_v3 = vld [vmem:[%s2813_s1 + $0x7] ss:$8 sm:$0xf] }
  0x1b   :  { %v196_v21 = vmul.f32 %v178_v9, %v1414_v13  ;;  %v182_v12 = vrot.slane %v1308_v58, %v1823_v62 }
  0x1c   :  { %v195_v13 = vmul.f32 %v174_v27, %v1418_v14 }
  0x1d   :  { %v197_v14 = vmul.f32 %v182_v12, %v1457_v25 }
  0x1e   :  { %217 = vrot.lane.b32.xlu1 %v1457_v25, %s1351_s14  ;;  %215 = vrot.lane.b32.xlu0 %v1461_v26, %s1351_s14 }
  0x22   :  { %221 = vrot.lane.b32.xlu1 %v1472_v29, %s1351_s14  ;;  %219 = vrot.lane.b32.xlu0 %v1477_v31, %s1351_s14 }
  0x26   :  { %281 = vrot.lane.b32.xlu1 %v1395_v7, %s1350_s26  ;;  %279 = vrot.lane.b32.xlu0 %v1390_v6, %s1350_s26 }
  0x2a   :  { %285 = vrot.lane.b32.xlu1 %v1380_v2, %s1350_s26  ;;  %283 = vrot.lane.b32.xlu0 %v1375_v1, %s1350_s26 }
  0x2e   :  { %289 = vrot.lane.b32.xlu1 %v1409_v11, %s1350_s26  ;;  %287 = vrot.lane.b32.xlu0 %v1400_v8, %s1350_s26 }
  0x32   :  { %293 = vrot.lane.b32.xlu1 %v1436_v18, %s1350_s26  ;;  %291 = vrot.lane.b32.xlu0 %v1427_v17, %s1350_s26 }
  0x36   :  { %391 = vrot.lane.b32.xlu1 %v1395_v7, %s1351_s14  ;;  %389 = vrot.lane.b32.xlu0 %v1390_v6, %s1351_s14 }
  0x3a   :  { %395 = vrot.lane.b32.xlu1 %v1380_v2, %s1351_s14  ;;  %393 = vrot.lane.b32.xlu0 %v1375_v1, %s1351_s14 }
  0x3e   :  { %399 = vrot.lane.b32.xlu1 %v1409_v11, %s1351_s14  ;;  %397 = vrot.lane.b32.xlu0 %v1400_v8, %s1351_s14 }
  0x42   :  { %403 = vrot.lane.b32.xlu1 %v1436_v18, %s1351_s14  ;;  %401 = vrot.lane.b32.xlu0 %v1427_v17, %s1351_s14 }
  0x46   :  { %487 = vrot.lane.b32.xlu1 %v1698_v15, %s1350_s26  ;;  %485 = vrot.lane.b32.xlu0 %v1702_v23, %s1350_s26 }
  0x4a   :  { %491 = vrot.lane.b32.xlu1 %v1710_v30, %s1350_s26  ;;  %489 = vrot.lane.b32.xlu0 %v1488_v35, %s1350_s26 }
  0x4e   :  { %495 = vrot.lane.b32.xlu1 %v1718_v43, %s1350_s26  ;;  %493 = vrot.lane.b32.xlu0 %v1501_v38, %s1350_s26 }
  0x52   :  { %499 = vrot.lane.b32.xlu1 %v1726_v34, %s1350_s26  ;;  %497 = vrot.lane.b32.xlu0 %v1539_v50, %s1350_s26 }
  0x56   :  { %597 = vrot.lane.b32.xlu1 %v1698_v15, %s1351_s14  ;;  %595 = vrot.lane.b32.xlu0 %v1702_v23, %s1351_s14 }
  0x5a   :  { %601 = vrot.lane.b32.xlu1 %v1710_v30, %s1351_s14  ;;  %599 = vrot.lane.b32.xlu0 %v1488_v35, %s1351_s14 }
  0x5e   :  { %605 = vrot.lane.b32.xlu1 %v1718_v43, %s1351_s14  ;;  %603 = vrot.lane.b32.xlu0 %v1501_v38, %s1351_s14  ;;  %v55_v43 = vrot.slane %v42_v48, %v1823_v62 }
  0x62   :  { %609 = vrot.lane.b32.xlu1 %v1726_v34, %s1351_s14  ;;  %607 = vrot.lane.b32.xlu0 %v1539_v50, %s1351_s14  ;;  %v65_v50 = vadd.f32 %v51_v61, %v1375_v1 }
  0x66   :  { %739 = vrot.lane.b32.xlu1 %v1754_v37, %s1350_s26  ;;  %737 = vrot.lane.b32.xlu0 %v1569_v56, %s1350_s26 }
  0x6a   :  { %743 = vrot.lane.b32.xlu1 %v1766_v49, %s1350_s26  ;;  %741 = vrot.lane.b32.xlu0 %v1580_v59, %s1350_s26 }
  0x6e   :  { %747 = vrot.lane.b32.xlu1 %v1778_v44, %s1350_s26  ;;  %745 = vrot.lane.b32.xlu0 %v1596_v63, %s1350_s26 }
  0x72   :  { %751 = vrot.lane.b32.xlu1 %v1790_v46, %s1350_s26  ;;  %749 = vrot.lane.b32.xlu0 %v1606_v5, %s1350_s26 }
  0x76   :  { %847 = vrot.lane.b32.xlu1 %v1754_v37, %s1351_s14  ;;  %845 = vrot.lane.b32.xlu0 %v1569_v56, %s1351_s14  ;;  %v186_v56 = vrot.slane %v1308_v58, %v1828_v28 }
  0x78   :  { %v104_v4 = vpop.permute.xlu1 %103  ;;  %v100_v42 = vpop.permute.xlu0 %99 }
  0x79   :  { %v119_v16 = vsel %vm113_vm4, %v100_v42, %v104_v4 }
  0x7a   :  { %v157_v10 = vmul.f32 %v139_v0, %v119_v16  ;;  %859 = vrot.lane.b32.xlu1 %v1790_v46, %s1351_s14  ;;  %857 = vrot.lane.b32.xlu0 %v1606_v5, %s1351_s14  ;;  %v192_v16 = vmul.f32 %v178_v9, %v1440_v19  ;;  %v191_v46 = vmul.f32 %v174_v27, %v1444_v20 }
  0x7b   :  { %v193_v19 = vmul.f32 %v182_v12, %v1461_v26  ;;  %v198_v20 = vmul.f32 %v186_v56, %v1472_v29  ;;  %v47_v27 = vrot.slane %v42_v48, %v1820_v57  ;;  %v66_v9 = vadd.f32 %v55_v43, %v1400_v8 }
  0x7c   :  { %v165_v37 = vadd.f32 %v157_v10, %v69_v33  ;;  %v102_v34 = vpop.permute.xlu1 %101  ;;  %v98_v38 = vpop.permute.xlu0 %97  ;;  %v143_v10 = vrot.slane %v130_v60, %v1823_v62  ;;  %v147_v29 = vrot.slane %v130_v60, %v1828_v28 }
  0x7d   :  { %v118_v5 = vsel %vm113_vm4, %v98_v38, %v102_v34 }
  0x7e   :  { %v153_v35 = vmul.f32 %v139_v0, %v118_v5  ;;  %851 = vrot.lane.b32.xlu1 %v1766_v49, %s1351_s14  ;;  %849 = vrot.lane.b32.xlu0 %v1580_v59, %s1351_s14  ;;  %v1851_v33 = vadd.f32 %v196_v21, %v165_v37  ;;  %v70_v5 = vadd.f32 %v55_v43, %v1409_v11 }
  0x7f   :  { %v59_v59 = vrot.slane %v42_v48, %v1828_v28  ;;  %v194_v21 = vmul.f32 %v186_v56, %v1477_v31  ;;  %v68_v31 = vadd.f32 %v47_v27, %v1395_v7  ;;  %v135_v56 = vrot.slane %v130_v60, %v1820_v57 }
  0x80   :  { %v161_v58 = vadd.f32 %v153_v35, %v65_v50  ;;  %v108_v61 = vpop.permute.xlu1 %107  ;;  %v106_v0 = vpop.permute.xlu0 %105  ;;  %v64_v43 = vadd.f32 %v47_v27, %v1390_v6 }
  0x81   :  { %v117_v25 = vsel %vm113_vm4, %v104_v4, %v108_v61  ;;  %v116_v26 = vsel %vm113_vm4, %v102_v34, %v106_v0  ;;  %v71_v48 = vadd.f32 %v59_v59, %v1436_v18 }
  0x82   :  { %v158_v12 = vmul.f32 %v143_v10, %v117_v25  ;;  %v154_v35 = vmul.f32 %v143_v10, %v116_v26  ;;  %855 = vrot.lane.b32.xlu1 %v1778_v44, %s1351_s14  ;;  %853 = vrot.lane.b32.xlu0 %v1596_v63, %s1351_s14  ;;  %v1870_v50 = vadd.f32 %v192_v16, %v161_v58 }
  0x83   :  { %v67_v10 = vadd.f32 %v59_v59, %v1427_v17 }
  0x84   :  { %v166_v34 = vadd.f32 %v158_v12, %v70_v5  ;;  %v162_v37 = vadd.f32 %v154_v35, %v66_v9  ;;  %v112_v4 = vpop.permute.xlu1 %111  ;;  %v110_v25 = vpop.permute.xlu0 %109 }
  0x85   :  { %v115_v16 = vsel %vm113_vm4, %v108_v61, %v112_v4  ;;  %v121_v58 = vsel %vm113_vm4, %v112_v4, %v100_v42  ;;  %v114_v26 = vsel %vm113_vm4, %v106_v0, %v110_v25  ;;  %v120_v60 = vsel %vm113_vm4, %v110_v25, %v98_v38 }
  0x86   :  { %v126_v27 = vsel %vm22_vm5, %v121_v58, 0.0  ;;  %v159_v5 = vmul.f32 %v147_v29, %v115_v16  ;;  %v122_v59 = vsel %vm22_vm5, %v120_v60, 0.0  ;;  %v155_v9 = vmul.f32 %v147_v29, %v114_v26  ;;  %917 = vrot.lane.b32.xlu1 %v1506_v39, %s1350_s26  ;;  %915 = vrot.lane.b32.xlu0 %v1493_v36, %s1350_s26 }
  0x87   :  { %v156_v42 = vmul.f32 %v135_v56, %v126_v27  ;;  %v152_v61 = vmul.f32 %v135_v56, %v122_v59  ;;  %v1894_v0 = vadd.f32 %v197_v14, %v166_v34  ;;  %v1896_v12 = vadd.f32 %v193_v19, %v162_v37  ;;  %v1311_v59 = vld [vmem:[%s2813_s1 + $0x4] ss:$8 sm:$0xf] }
  0x88   :  { %v167_v38 = vadd.f32 %v159_v5, %v71_v48  ;;  %v163_v35 = vadd.f32 %v155_v9, %v67_v10  ;;  %v210_v4 = vpop.permute.xlu1 %209  ;;  %v208_v25 = vpop.permute.xlu0 %207  ;;  %v1310_v5 = vld [vmem:[%s2813_s1 + $0x3] ss:$8 sm:$0xf]  ;;  %v368_v63 = vrot.slane %v1311_v59, %v1828_v28 }
  0x89   :  { %v164_v16 = vadd.f32 %v156_v42, %v68_v31  ;;  %v160_v58 = vadd.f32 %v152_v61, %v64_v43  ;;  %v325_v49 = vrot.slane %v1310_v5, %v1823_v62 }
  0x8a   :  { %v206_v60 = vadd.f32 %v198_v20, %v167_v38  ;;  %v202_v29 = vadd.f32 %v194_v21, %v163_v35  ;;  %929 = vrot.lane.b32.xlu1 %v1565_v55, %s1350_s26  ;;  %927 = vrot.lane.b32.xlu0 %v1560_v54, %s1350_s26  ;;  %v1911_v20 = vadd.s32 384, %v1803_v53 }
  0x8b   :  { %v1902_v26 = vadd.f32 %v195_v13, %v164_v16  ;;  %v1904_v14 = vadd.f32 %v191_v46, %v160_v58  ;;  %v1309_v13 = vld [vmem:[%s2813_s1 + $0x2] ss:$8 sm:$0xf] }
  0x8c   :  { %v214_v19 = vpop.permute.xlu1 %213  ;;  %v212_v56 = vpop.permute.xlu0 %211  ;;  %2880 = vst [vmem:[#allocation20_spill] sm:$0xff] %v1911_v20  ;;  %vm29_vm6 = vcmp.lt.s32.totalorder %v1911_v20, 480  ;;  %v258_v46 = vrot.slane %v1309_v13, %v1828_v28  ;;  %v250_v43 = vrot.slane %v1309_v13, %v1793_v47  ;;  %v246_v9 = vrot.slane %v1309_v13, %v1820_v57 }
  0x8d   :  { %v254_v42 = vrot.slane %v1309_v13, %v1823_v62  ;;  %v360_v20 = vrot.slane %v1311_v59, %v1793_v47 }
  0x8e   :  { %921 = vrot.lane.b32.xlu1 %v1516_v41, %s1350_s26  ;;  %919 = vrot.lane.b32.xlu0 %v1511_v40, %s1350_s26 }
  0x90   :  { %v218_v21 = vpop.permute.xlu1 %217  ;;  %v216_v31 = vpop.permute.xlu0 %215 }
  0x91   :  { %v227_v48 = vsel %vm223_vm7, %v214_v19, %v218_v21  ;;  %v226_v35 = vsel %vm223_vm7, %v212_v56, %v216_v31 }
  0x92   :  { %925 = vrot.lane.b32.xlu1 %v1544_v51, %s1350_s26  ;;  %923 = vrot.lane.b32.xlu0 %v1528_v45, %s1350_s26  ;;  %v268_v13 = vmul.f32 %v250_v43, %v227_v48  ;;  %v264_v48 = vmul.f32 %v250_v43, %v226_v35 }
  0x94   :  { %v222_v34 = vpop.permute.xlu1 %221  ;;  %v220_v37 = vpop.permute.xlu0 %219 }
  0x95   :  { %v231_v10 = vsel %vm223_vm7, %v222_v34, %v210_v4  ;;  %v230_v27 = vsel %vm223_vm7, %v220_v37, %v208_v25  ;;  %v224_v23 = vsel %vm223_vm7, %v216_v31, %v220_v37  ;;  %v364_v31 = vrot.slane %v1311_v59, %v1823_v62 }
  0x96   :  { %v239_v61 = vsel %vm29_vm6, %v231_v10, 0.0  ;;  %v235_v38 = vsel %vm29_vm6, %v230_v27, 0.0  ;;  %1025 = vrot.lane.b32.xlu1 %v1506_v39, %s1351_s14  ;;  %1023 = vrot.lane.b32.xlu0 %v1493_v36, %s1351_s14  ;;  %v321_v27 = vrot.slane %v1310_v5, %v1793_v47  ;;  %v228_v37 = vsel %vm223_vm7, %v208_v25, %v212_v56 }
  0x97   :  { %v270_v16 = vmul.f32 %v258_v46, %v239_v61  ;;  %v266_v58 = vmul.f32 %v258_v46, %v235_v38  ;;  %v1961_v61 = vrot.slane %v1310_v5, %v1820_v57  ;;  %v329_v46 = vrot.slane %v1310_v5, %v1828_v28 }
  0x98   :  { %v1949_v44 = vpop.permute.xlu1 %281  ;;  %v1951_v10 = vpop.permute.xlu0 %279  ;;  %v225_v38 = vsel %vm223_vm7, %v218_v21, %v222_v34  ;;  %v2882_v5 = vrot.slane %v1493_v36, 1  ;;  %v356_v21 = vrot.slane %v1311_v59, %v1820_v57  ;;  %v229_v34 = vsel %vm223_vm7, %v210_v4, %v214_v19 }
  0x99   :  { %v1956_v30 = vadd.f32 %v270_v16, %v206_v60  ;;  %v1958_v15 = vadd.f32 %v266_v58, %v202_v29  ;;  %v1973_v60 = vmul.f32 %v368_v63, %v1436_v18  ;;  %v2881_v29 = vrot.slane %v1506_v39, 1 }
  0x9a   :  { %1037 = vrot.lane.b32.xlu1 %v1565_v55, %s1351_s14  ;;  %1035 = vrot.lane.b32.xlu0 %v1560_v54, %s1351_s14  ;;  %v276_v18 = vadd.f32 %v268_v13, %v1851_v33  ;;  %v378_v36 = vmul.f32 %v360_v20, %v1380_v2  ;;  %v269_v16 = vmul.f32 %v254_v42, %v225_v38 }
  0x9b   :  { %v1981_v43 = vsel %vm468_vm2, %v2882_v5, %v2881_v29  ;;  %v265_v58 = vmul.f32 %v254_v42, %v224_v23  ;;  %v272_v4 = vadd.f32 %v264_v48, %v1870_v50  ;;  %v376_v2 = vmul.f32 %v368_v63, %v1427_v17 }
  0x9c   :  { %v286_v35 = vpop.permute.xlu1 %285  ;;  %v284_v39 = vpop.permute.xlu0 %283  ;;  %v374_v23 = vmul.f32 %v360_v20, %v1375_v1  ;;  %v379_v33 = vmul.f32 %v364_v31, %v1409_v11  ;;  %v375_v56 = vmul.f32 %v364_v31, %v1400_v8  ;;  %v267_v42 = vmul.f32 %v246_v9, %v229_v34 }
  0x9d   :  { %v300_v29 = vsel %vm113_vm4, %v1949_v44, %v286_v35  ;;  %v299_v59 = vsel %vm113_vm4, %v1951_v10, %v284_v39  ;;  %v263_v13 = vmul.f32 %v246_v9, %v228_v37  ;;  %v277_v5 = vadd.f32 %v269_v16, %v1894_v0 }
  0x9e   :  { %v339_v19 = vmul.f32 %v321_v27, %v300_v29  ;;  %v335_v25 = vmul.f32 %v321_v27, %v299_v59  ;;  %1029 = vrot.lane.b32.xlu1 %v1516_v41, %s1351_s14  ;;  %1027 = vrot.lane.b32.xlu0 %v1511_v40, %s1351_s14  ;;  %v273_v29 = vadd.f32 %v265_v58, %v1896_v12  ;;  %v2883_v63 = vrot.slane %v1565_v55, 1 }
  0x9f   :  { %v2884_v0 = vrot.slane %v1560_v54, 1  ;;  %v377_v20 = vmul.f32 %v356_v21, %v1395_v7  ;;  %v275_v31 = vadd.f32 %v267_v42, %v1902_v26  ;;  %v271_v34 = vadd.f32 %v263_v13, %v1904_v14 }
  0xa0   :  { %v347_v38 = vadd.f32 %v339_v19, %v276_v18  ;;  %v343_v50 = vadd.f32 %v335_v25, %v272_v4  ;;  %v290_v48 = vpop.permute.xlu1 %289  ;;  %v288_v27 = vpop.permute.xlu0 %287 }
  0xa1   :  { %v298_v59 = vsel %vm113_vm4, %v286_v35, %v290_v48  ;;  %v297_v1 = vsel %vm113_vm4, %v284_v39, %v288_v27  ;;  %v2024_v12 = vsel %vm468_vm2, %v2884_v0, %v2883_v63 }
  0xa2   :  { %v340_v17 = vmul.f32 %v325_v49, %v298_v59  ;;  %v336_v11 = vmul.f32 %v325_v49, %v297_v1  ;;  %1033 = vrot.lane.b32.xlu1 %v1544_v51, %s1351_s14  ;;  %1031 = vrot.lane.b32.xlu0 %v1528_v45, %s1351_s14  ;;  %v2016_v8 = vadd.f32 %v378_v36, %v347_v38 }
  0xa3   :  { %2885 = vst [vmem:[#allocation21_spill] sm:$0xff] %v2024_v12  ;;  %v373_v49 = vmul.f32 %v356_v21, %v1390_v6  ;;  %v2028_v9 = vadd.f32 %v374_v23, %v343_v50  ;;  %v2889_v50 = vrot.slane %v1544_v51, 1  ;;  %v562_v59 = vrot.slane %v1314_v3, %v1820_v57 }
  0xa4   :  { %v348_v37 = vadd.f32 %v340_v17, %v277_v5  ;;  %v344_v18 = vadd.f32 %v336_v11, %v273_v29  ;;  %v294_v35 = vpop.permute.xlu1 %293  ;;  %v292_v55 = vpop.permute.xlu0 %291  ;;  %v566_v1 = vrot.slane %v1314_v3, %v1793_v47  ;;  %v570_v17 = vrot.slane %v1314_v3, %v1823_v62  ;;  %v1312_v11 = vld [vmem:[%s2813_s1 + $0x5] ss:$8 sm:$0xf] }
  0xa5   :  { %v296_v54 = vsel %vm113_vm4, %v290_v48, %v294_v35  ;;  %v302_v39 = vsel %vm113_vm4, %v294_v35, %v1949_v44  ;;  %v295_v6 = vsel %vm113_vm4, %v288_v27, %v292_v55  ;;  %v301_v7 = vsel %vm113_vm4, %v292_v55, %v1951_v10  ;;  %v2895_v35 = vld [vmem:[#allocation2_spill] sm:$0xff] }
  0xa6   :  { %v307_v26 = vsel %vm22_vm5, %v302_v39, 0.0  ;;  %v341_v14 = vmul.f32 %v329_v46, %v296_v54  ;;  %v303_v21 = vsel %vm22_vm5, %v301_v7, 0.0  ;;  %v337_v36 = vmul.f32 %v329_v46, %v295_v6  ;;  %1119 = vrot.lane.b32.xlu1 %v1632_v22, %s1350_s26  ;;  %1117 = vrot.lane.b32.xlu0 %v1981_v43, %s1350_s26  ;;  %v1313_v54 = vld [vmem:[%s2813_s1 + $0x6] ss:$8 sm:$0xf] }
  0xa7   :  { %v338_v44 = vmul.f32 %v1961_v61, %v307_v26  ;;  %v334_v16 = vmul.f32 %v1961_v61, %v303_v21  ;;  %v2052_v58 = vadd.f32 %v379_v33, %v348_v37  ;;  %v2054_v10 = vadd.f32 %v375_v56, %v344_v18  ;;  %v2894_v37 = vld [vmem:[#allocation13_spill] sm:$0xff]  ;;  %v2896_v39 = vld [vmem:[#allocation14_spill] sm:$0xff]  ;;  %v2897_v7 = vld [vmem:[#allocation3_spill] sm:$0xff] }
  0xa8   :  { %v349_v4 = vadd.f32 %v341_v14, %v1956_v30  ;;  %v345_v19 = vadd.f32 %v337_v36, %v1958_v15  ;;  %v2058_v25 = vpop.permute.xlu1 %391  ;;  %v2060_v46 = vpop.permute.xlu0 %389  ;;  %v2886_v61 = vrot.slane %v1516_v41, 1  ;;  %v2887_v33 = vrot.slane %v1511_v40, 1 }
  0xa9   :  { %v346_v23 = vadd.f32 %v338_v44, %v275_v31  ;;  %v342_v42 = vadd.f32 %v334_v16, %v271_v34  ;;  %v2890_v48 = vrot.slane %v1528_v45, 1  ;;  %v2893_v31 = vld [vmem:[#allocation11_spill] sm:$0xff]  ;;  %v2123_v18 = vmul.f32 %v566_v1, %v2894_v37 }
  0xaa   :  { %v2063_v13 = vadd.f32 %v1973_v60, %v349_v4  ;;  %v2065_v38 = vadd.f32 %v376_v2, %v345_v19  ;;  %1131 = vrot.lane.b32.xlu1 %v1645_v24, %s1350_s26  ;;  %1129 = vrot.lane.b32.xlu0 %v2024_v12, %s1350_s26  ;;  %v2081_v60 = vsel %vm468_vm2, %v2887_v33, %v2886_v61 }
  0xab   :  { %v2071_v30 = vadd.f32 %v377_v20, %v346_v23  ;;  %v2073_v15 = vadd.f32 %v373_v49, %v342_v42  ;;  %2888 = vst [vmem:[#allocation22_spill] sm:$0xff] %v2081_v60  ;;  %v2093_v41 = vsel %vm468_vm2, %v2890_v48, %v2889_v50  ;;  %v2892_v20 = vld [vmem:[#allocation12_spill] sm:$0xff]  ;;  %v2120_v34 = vmul.f32 %v562_v59, %v2893_v31 }
  0xac   :  { %v396_v2 = vpop.permute.xlu1 %395  ;;  %v394_v56 = vpop.permute.xlu0 %393  ;;  %2891 = vst [vmem:[#allocation23_spill] sm:$0xff] %v2093_v41  ;;  %v2117_v49 = vmul.f32 %v562_v59, %v2892_v20  ;;  %v2126_v55 = vmul.f32 %v566_v1, %v2895_v35  ;;  %v2136_v6 = vmul.f32 %v570_v17, %v2896_v39  ;;  %v2139_v26 = vmul.f32 %v570_v17, %v2897_v7  ;;  %v2156_v42 = vld [vmem:[%s2813_s1 + $0x20] ss:$8 sm:$0xf] }
  0xad   :  { %v2142_v14 = vrot.slane %v1314_v3, %v1828_v28  ;;  %v427_v21 = vrot.slane %v1312_v11, %v1820_v57  ;;  %v410_v36 = vsel %vm223_vm7, %v2058_v25, %v396_v2  ;;  %v409_v44 = vsel %vm223_vm7, %v2060_v46, %v394_v56 }
  0xae   :  { %1123 = vrot.lane.b32.xlu1 %v1660_v32, %s1350_s26  ;;  %1121 = vrot.lane.b32.xlu0 %v2081_v60, %s1350_s26  ;;  %v431_v16 = vrot.slane %v1312_v11, %v1793_v47  ;;  %v435_v4 = vrot.slane %v1312_v11, %v1823_v62  ;;  %v439_v50 = vrot.slane %v1312_v11, %v1828_v28 }
  0xaf   :  { %v527_v48 = vrot.slane %v1313_v54, %v1793_v47  ;;  %v531_v3 = vrot.slane %v1313_v54, %v1823_v62  ;;  %v523_v59 = vrot.slane %v1313_v54, %v1820_v57  ;;  %v535_v1 = vrot.slane %v1313_v54, %v1828_v28 }
  0xb0   :  { %v400_v40 = vpop.permute.xlu1 %399  ;;  %v398_v27 = vpop.permute.xlu0 %397  ;;  %v444_v17 = vmul.f32 %v427_v21, %v409_v44  ;;  %v2175_v11 = vrot.slane %v2156_v42, %v1793_v47 }
  0xb1   :  { %v408_v61 = vsel %vm223_vm7, %v396_v2, %v400_v40  ;;  %v407_v33 = vsel %vm223_vm7, %v394_v56, %v398_v27  ;;  %v448_v2 = vmul.f32 %v427_v21, %v410_v36  ;;  %v633_v56 = vrot.slane %v2156_v42, %v1820_v57 }
  0xb2   :  { %1127 = vrot.lane.b32.xlu1 %v1675_v52, %s1350_s26  ;;  %1125 = vrot.lane.b32.xlu0 %v2093_v41, %s1350_s26  ;;  %v449_v20 = vmul.f32 %v431_v16, %v408_v61  ;;  %v445_v31 = vmul.f32 %v431_v16, %v407_v33 }
  0xb3   :  { %v456_v33 = vadd.f32 %v448_v2, %v2071_v30 }
  0xb4   :  { %v404_v5 = vpop.permute.xlu1 %403  ;;  %v402_v29 = vpop.permute.xlu0 %401  ;;  %v457_v30 = vadd.f32 %v449_v20, %v2016_v8 }
  0xb5   :  { %v406_v37 = vsel %vm223_vm7, %v400_v40, %v404_v5  ;;  %v405_v35 = vsel %vm223_vm7, %v398_v27, %v402_v29  ;;  %v412_v54 = vsel %vm223_vm7, %v404_v5, %v2058_v25  ;;  %v411_v21 = vsel %vm223_vm7, %v402_v29, %v2060_v46 }
  0xb6   :  { %1227 = vrot.lane.b32.xlu1 %v1632_v22, %s1351_s14  ;;  %1225 = vrot.lane.b32.xlu0 %v1981_v43, %s1351_s14  ;;  %v450_v5 = vmul.f32 %v435_v4, %v406_v37  ;;  %v446_v46 = vmul.f32 %v435_v4, %v405_v35 }
  0xb8   :  { %v488_v45 = vpop.permute.xlu1 %487  ;;  %v486_v51 = vpop.permute.xlu0 %485  ;;  %v458_v35 = vadd.f32 %v450_v5, %v2052_v58 }
  0xba   :  { %1239 = vrot.lane.b32.xlu1 %v1645_v24, %s1351_s14  ;;  %1237 = vrot.lane.b32.xlu0 %v2024_v12, %s1351_s14 }
  0xbc   :  { %v492_v63 = vpop.permute.xlu1 %491  ;;  %v490_v0 = vpop.permute.xlu0 %489 }
  0xbd   :  { %v506_v40 = vsel %vm113_vm4, %v488_v45, %v492_v63  ;;  %v505_v27 = vsel %vm113_vm4, %v486_v51, %v490_v0 }
  0xbe   :  { %1231 = vrot.lane.b32.xlu1 %v1660_v32, %s1351_s14  ;;  %1229 = vrot.lane.b32.xlu0 %v2081_v60, %s1351_s14  ;;  %v541_v12 = vmul.f32 %v527_v48, %v505_v27 }
  0xc0   :  { %v496_v19 = vpop.permute.xlu1 %495  ;;  %v494_v23 = vpop.permute.xlu0 %493 }
  0xc1   :  { %v504_v37 = vsel %vm113_vm4, %v492_v63, %v496_v19  ;;  %v503_v4 = vsel %vm113_vm4, %v490_v0, %v494_v23 }
  0xc2   :  { %1235 = vrot.lane.b32.xlu1 %v1675_v52, %s1351_s14  ;;  %1233 = vrot.lane.b32.xlu0 %v2093_v41, %s1351_s14  ;;  %v452_v41 = vadd.f32 %v444_v17, %v2073_v15  ;;  %v453_v15 = vadd.f32 %v445_v31, %v2028_v9 }
  0xc4   :  { %v500_v39 = vpop.permute.xlu1 %499  ;;  %v498_v7 = vpop.permute.xlu0 %497  ;;  %v549_v9 = vadd.f32 %v541_v12, %v453_v15  ;;  %v641_v12 = vrot.slane %v2156_v42, %v1823_v62 }
  0xc5   :  { %v508_v36 = vsel %vm113_vm4, %v500_v39, %v488_v45  ;;  %v507_v44 = vsel %vm113_vm4, %v498_v7, %v486_v51  ;;  %v420_v45 = vsel %vm29_vm6, %v412_v54, 0.0  ;;  %v416_v51 = vsel %vm29_vm6, %v411_v21, 0.0 }
  0xc6   :  { %v513_v16 = vsel %vm22_vm5, %v508_v36, 0.0  ;;  %v509_v25 = vsel %vm22_vm5, %v507_v44, 0.0  ;;  %v545_v36 = vmul.f32 %v527_v48, %v506_v40  ;;  %v451_v17 = vmul.f32 %v439_v50, %v420_v45  ;;  %v2900_v45 = vld [vmem:[#allocation15_spill] sm:$0xff] }
  0xc7   :  { %v544_v29 = vmul.f32 %v523_v59, %v513_v16  ;;  %v540_v61 = vmul.f32 %v523_v59, %v509_v25  ;;  %v447_v54 = vmul.f32 %v439_v50, %v416_v51  ;;  %v454_v21 = vadd.f32 %v446_v46, %v2054_v10 }
  0xc8   :  { %v598_v60 = vpop.permute.xlu1 %597  ;;  %v596_v32 = vpop.permute.xlu0 %595  ;;  %v546_v44 = vmul.f32 %v531_v3, %v504_v37  ;;  %v542_v48 = vmul.f32 %v531_v3, %v503_v4  ;;  %v502_v63 = vsel %vm113_vm4, %v496_v19, %v500_v39  ;;  %v501_v0 = vsel %vm113_vm4, %v494_v23, %v498_v7  ;;  %v2899_v19 = vld [vmem:[#allocation4_spill] sm:$0xff] }
  0xc9   :  { %v552_v59 = vadd.f32 %v544_v29, %v456_v33  ;;  %v548_v2 = vadd.f32 %v540_v61, %v452_v41  ;;  %v553_v20 = vadd.f32 %v545_v36, %v457_v30  ;;  %v582_v39 = vmul.f32 %v2142_v14, %v2899_v19 }
  0xca   :  { %v547_v23 = vmul.f32 %v535_v1, %v502_v63  ;;  %v543_v7 = vmul.f32 %v535_v1, %v501_v0  ;;  %v554_v27 = vadd.f32 %v546_v44, %v458_v35  ;;  %v550_v16 = vadd.f32 %v542_v48, %v454_v21 }
  0xcb   :  { %v591_v10 = vadd.f32 %v2120_v34, %v552_v59  ;;  %v587_v3 = vadd.f32 %v2117_v49, %v548_v2  ;;  %v459_v34 = vadd.f32 %v451_v17, %v2063_v13  ;;  %v455_v61 = vadd.f32 %v447_v54, %v2065_v38 }
  0xcc   :  { %v602_v40 = vpop.permute.xlu1 %601  ;;  %v600_v8 = vpop.permute.xlu0 %599  ;;  %v592_v1 = vadd.f32 %v2123_v18, %v553_v20  ;;  %v588_v38 = vadd.f32 %v2126_v55, %v549_v9  ;;  %v586_v51 = vmul.f32 %v2142_v14, %v2900_v45  ;;  %v645_v4 = vrot.slane %v2156_v42, %v1828_v28  ;;  %v683_v45 = vld [vmem:[%s2812_s2] sm:$0xf] }
  0xcd   :  { %v616_v41 = vsel %vm223_vm7, %v598_v60, %v602_v40  ;;  %v615_v58 = vsel %vm223_vm7, %v596_v32, %v600_v8  ;;  %v555_v36 = vadd.f32 %v547_v23, %v459_v34  ;;  %v551_v37 = vadd.f32 %v543_v7, %v455_v61 }
  0xce   :  { %v654_v50 = vmul.f32 %v633_v56, %v616_v41  ;;  %v650_v31 = vmul.f32 %v633_v56, %v615_v58  ;;  %v593_v59 = vadd.f32 %v2136_v6, %v554_v27  ;;  %v589_v18 = vadd.f32 %v2139_v26, %v550_v16 }
  0xcf   :  { %v594_v54 = vadd.f32 %v586_v51, %v555_v36  ;;  %v590_v21 = vadd.f32 %v582_v39, %v551_v37  ;;  %v2904_v37 = vld [vmem:[#allocation16_spill] sm:$0xff] }
  0xd0   :  { %v662_v25 = vadd.f32 %v654_v50, %v591_v10  ;;  %v658_v5 = vadd.f32 %v650_v31, %v587_v3  ;;  %v606_v46 = vpop.permute.xlu1 %605  ;;  %v604_v29 = vpop.permute.xlu0 %603 }
  0xd1   :  { %v614_v49 = vsel %vm223_vm7, %v602_v40, %v606_v46  ;;  %v613_v56 = vsel %vm223_vm7, %v600_v8, %v604_v29 }
  0xd2   :  { %670 = vst [vmem:[%s2814_s3 + $0x20] sm:$0xff] %v662_v25  ;;  %666 = vst [vmem:[%s2814_s3] sm:$0xff] %v658_v5  ;;  %v655_v13 = vmul.f32 %v2175_v11, %v614_v49  ;;  %v651_v33 = vmul.f32 %v2175_v11, %v613_v56  ;;  %v1330_v56 = vld [vmem:[%s2813_s1 + $0x7] ss:$8 sm:$0xf] }
  0xd3   :  { %v1192_v51 = vrot.slane %v1330_v56, %v1820_v57  ;;  %v1204_v36 = vrot.slane %v1330_v56, %v1828_v28 }
  0xd4   :  { %v663_v30 = vadd.f32 %v655_v13, %v592_v1  ;;  %v659_v15 = vadd.f32 %v651_v33, %v588_v38  ;;  %v610_v2 = vpop.permute.xlu1 %609  ;;  %v608_v17 = vpop.permute.xlu0 %607 }
  0xd5   :  { %v612_v55 = vsel %vm223_vm7, %v606_v46, %v610_v2  ;;  %v618_v11 = vsel %vm223_vm7, %v610_v2, %v598_v60  ;;  %v611_v14 = vsel %vm223_vm7, %v604_v29, %v608_v17  ;;  %v617_v42 = vsel %vm223_vm7, %v608_v17, %v596_v32  ;;  %v1324_v46 = vld [vmem:[%s2813_s1 + $0x1] ss:$8 sm:$0xf] }
  0xd6   :  { %671 = vst [vmem:[%s2814_s3 + $0x28] sm:$0xff] %v663_v30  ;;  %667 = vst [vmem:[%s2814_s3 + $0x8] sm:$0xff] %v659_v15  ;;  %v626_v6 = vsel %vm29_vm6, %v618_v11, 0.0  ;;  %v656_v26 = vmul.f32 %v641_v12, %v612_v55  ;;  %v622_v60 = vsel %vm29_vm6, %v617_v42, 0.0  ;;  %v652_v35 = vmul.f32 %v641_v12, %v611_v14  ;;  %v2905_v30 = vld [vmem:[#allocation5_spill] sm:$0xff]  ;;  %v2907_v17 = vld [vmem:[#allocation6_spill] sm:$0xff] }
  0xd7   :  { %v657_v44 = vmul.f32 %v645_v4, %v626_v6  ;;  %v653_v32 = vmul.f32 %v645_v4, %v622_v60  ;;  %v812_v61 = vrot.slane %v1324_v46, %v1820_v57  ;;  %v816_v49 = vrot.slane %v1324_v46, %v1793_v47  ;;  %v2908_v11 = vld [vmem:[#allocation18_spill] sm:$0xff] }
  0xd8   :  { %v664_v48 = vadd.f32 %v656_v26, %v593_v59  ;;  %v660_v63 = vadd.f32 %v652_v35, %v589_v18  ;;  %v2267_v0 = vpop.permute.xlu1 %739  ;;  %v2269_v40 = vpop.permute.xlu0 %737  ;;  %v820_v1 = vrot.slane %v1324_v46, %v1823_v62  ;;  %v824_v33 = vrot.slane %v1324_v46, %v1828_v28  ;;  %v2906_v59 = vld [vmem:[#allocation17_spill] sm:$0xff]  ;;  %v2910_v35 = vld [vmem:[#allocation7_spill] sm:$0xff] }
  0xd9   :  { %v665_v8 = vadd.f32 %v657_v44, %v594_v54  ;;  %v661_v20 = vadd.f32 %v653_v32, %v590_v21  ;;  %v2347_v4 = vmul.f32 %v812_v61, %v2904_v37  ;;  %v2350_v15 = vmul.f32 %v812_v61, %v2905_v30  ;;  %v2911_v21 = vld [vmem:[#allocation19_spill] sm:$0xff]  ;;  %v2912_v32 = vld [vmem:[#allocation8_spill] sm:$0xff] }
  0xda   :  { %672 = vst [vmem:[%s2814_s3 + $0x30] sm:$0xff] %v664_v48  ;;  %668 = vst [vmem:[%s2814_s3 + $0x10] sm:$0xff] %v660_v63  ;;  %v2353_v2 = vmul.f32 %v816_v49, %v2906_v59  ;;  %v1196_v18 = vrot.slane %v1330_v56, %v1793_v47  ;;  %v2357_v55 = vmul.f32 %v816_v49, %v2907_v17  ;;  %v769_v63 = vld [vmem:[%s2813_s1] ss:$8 sm:$0xf] }
  0xdb   :  { %673 = vst [vmem:[%s2814_s3 + $0x38] sm:$0xff] %v665_v8  ;;  %669 = vst [vmem:[%s2814_s3 + $0x18] sm:$0xff] %v661_v20  ;;  %v2360_v14 = vmul.f32 %v820_v1, %v2908_v11  ;;  %v1200_v42 = vrot.slane %v1330_v56, %v1823_v62  ;;  %v692_v6 = vrot.slane %v683_v45, %v1793_v47  ;;  %v1327_v61 = vld [vmem:[%s2813_s1 + $0x4] ss:$8 sm:$0xf] }
  0xdc   :  { %v744_v9 = vpop.permute.xlu1 %743  ;;  %v742_v41 = vpop.permute.xlu0 %741  ;;  %v2369_v54 = vmul.f32 %v820_v1, %v2910_v35  ;;  %v2372_v44 = vmul.f32 %v824_v33, %v2911_v21  ;;  %v2375_v48 = vmul.f32 %v824_v33, %v2912_v32  ;;  %v696_v8 = vrot.slane %v683_v45, %v1823_v62  ;;  %v2916_v49 = vld [vmem:[#allocation21_spill] sm:$0xff]  ;;  %v2924_v30 = vld [vmem:[#allocation23_spill] sm:$0xff]  ;;  %v1344_v32 = vld [vmem:[%s2811_s0 + $0x70] sm:$0xff] }
  0xdd   :  { %v2286_v58 = vsel %vm113_vm4, %v2267_v0, %v744_v9  ;;  %v2291_v10 = vsel %vm113_vm4, %v2269_v40, %v742_v41  ;;  %v2382_v20 = vmul.f32 %v1192_v51, %v1632_v22  ;;  %v688_v46 = vrot.slane %v683_v45, %v1820_v57  ;;  %v2918_v1 = vld [vmem:[#allocation9_spill] sm:$0xff]  ;;  %v2920_v22 = vld [vmem:[#allocation22_spill] sm:$0xff]  ;;  %v1342_v17 = vld [vmem:[%s2811_s0 + $0x68] sm:$0xff] }
  0xde   :  { %v2395_v56 = vmul.f32 %v1204_v36, %v2916_v49  ;;  %v2398_v33 = vmul.f32 %v1196_v18, %v2918_v1  ;;  %v2401_v37 = vmul.f32 %v1196_v18, %v2920_v22  ;;  %v2408_v59 = vmul.f32 %v1200_v42, %v2924_v30  ;;  %v1325_v18 = vld [vmem:[%s2813_s1 + $0x2] ss:$8 sm:$0xf] }
  0xdf   :  { %2913 = vst [vmem:[#allocation14_spill] sm:$0xff] %v2382_v20  ;;  %v778_v11 = vrot.slane %v769_v63, %v1793_v47  ;;  %v711_v49 = vadd.f32 %v1344_v32, %v696_v8  ;;  %v782_v1 = vrot.slane %v769_v63, %v1823_v62  ;;  %v990_v22 = vrot.slane %v1327_v61, %v1820_v57 }
  0xe0   :  { %v2293_v50 = vpop.permute.xlu1 %747  ;;  %v2295_v3 = vpop.permute.xlu0 %745  ;;  %2917 = vst [vmem:[#allocation4_spill] sm:$0xff] %v2395_v56  ;;  %2919 = vst [vmem:[#allocation15_spill] sm:$0xff] %v2398_v33  ;;  %v1326_v33 = vld [vmem:[%s2813_s1 + $0x3] ss:$8 sm:$0xf] }
  0xe1   :  { %v2300_v31 = vsel %vm113_vm4, %v744_v9, %v2293_v50  ;;  %v2305_v19 = vsel %vm113_vm4, %v742_v41, %v2295_v3  ;;  %v2385_v9 = vmul.f32 %v1192_v51, %v1981_v43  ;;  %v2388_v41 = vmul.f32 %v1204_v36, %v1645_v24  ;;  %2921 = vst [vmem:[#allocation16_spill] sm:$0xff] %v2401_v37  ;;  %v2922_v51 = vld [vmem:[#allocation10_spill] sm:$0xff] }
  0xe2   :  { %v700_v43 = vrot.slane %v683_v45, %v1828_v28  ;;  %v2405_v24 = vmul.f32 %v1200_v42, %v2922_v51  ;;  %2925 = vst [vmem:[#allocation17_spill] sm:$0xff] %v2408_v59  ;;  %v710_v36 = vadd.f32 %v1342_v17, %v692_v6  ;;  %v1343_v42 = vld [vmem:[%s2811_s0 + $0x48] sm:$0xff]  ;;  %v2432_v51 = vld [vmem:[%s2811_s0 + $0x50] sm:$0xff]  ;;  %v786_v37 = vrot.slane %v769_v63, %v1828_v28 }
  0xe3   :  { %2914 = vst [vmem:[#allocation3_spill] sm:$0xff] %v2385_v9  ;;  %2915 = vst [vmem:[#allocation20_spill] sm:$0xff] %v2388_v41  ;;  %v706_v21 = vadd.f32 %v1343_v42, %v692_v6  ;;  %v707_v30 = vadd.f32 %v2432_v51, %v696_v8  ;;  %v1346_v6 = vld [vmem:[%s2811_s0 + $0x60] sm:$0xff]  ;;  %v1347_v9 = vld [vmem:[%s2811_s0 + $0x78] sm:$0xff] }
  0xe4   :  { %v2307_v39 = vpop.permute.xlu1 %751  ;;  %v2309_v23 = vpop.permute.xlu0 %749  ;;  %2923 = vst [vmem:[#allocation5_spill] sm:$0xff] %v2405_v24  ;;  %v709_v59 = vadd.f32 %v1346_v6, %v688_v46  ;;  %v774_v24 = vrot.slane %v769_v63, %v1820_v57  ;;  %v712_v20 = vadd.f32 %v1347_v9, %v700_v43  ;;  %v1348_v8 = vld [vmem:[%s2811_s0 + $0x40] sm:$0xff]  ;;  %v1349_v41 = vld [vmem:[%s2811_s0 + $0x58] sm:$0xff]  ;;  %v2453_v63 = vrot.slane %v1325_v18, %v1828_v28 }
  0xe5   :  { %v705_v56 = vadd.f32 %v1348_v8, %v688_v46  ;;  %v2464_v46 = vrot.slane %v1325_v18, %v1820_v57 }
  0xe6   :  { %2928 = vst [vmem:[#allocation7_spill] sm:$0xff] %v2453_v63  ;;  %v2474_v63 = vrot.slane %v1325_v18, %v1823_v62 }
  0xe7   :  { %2929 = vst [vmem:[#allocation19_spill] sm:$0xff] %v2464_v46 }
  0xe8   :  { %v2311_v7 = vpop.permute.xlu1 %847  ;;  %v2313_v12 = vpop.permute.xlu0 %845  ;;  %2933 = vst [vmem:[#allocation22_spill] sm:$0xff] %v2474_v63  ;;  %v994_v63 = vrot.slane %v1327_v61, %v1793_v47 }
  0xec   :  { %v2315_v27 = vpop.permute.xlu1 %859  ;;  %v2317_v16 = vpop.permute.xlu0 %857 }
  0xf0   :  { %v2319_v25 = vpop.permute.xlu1 %851  ;;  %v2321_v5 = vpop.permute.xlu0 %849 }
  0xf4   :  { %v2326_v29 = vpop.permute.xlu1 %855  ;;  %v2328_v34 = vpop.permute.xlu0 %853 }
  0xf5   :  { %2901 = vst [vmem:[#allocation12_spill] sm:$0xff] %v2326_v29  ;;  %2902 = vst [vmem:[#allocation11_spill] sm:$0xff] %v2328_v34  ;;  %v759_v34 = vsel %vm113_vm4, %v2309_v23, %v2269_v40  ;;  %v2467_v29 = vrot.slane %v1325_v18, %v1793_v47  ;;  %v2482_v40 = vmul.f32 %v1346_v6, %v990_v22 }
  0xf6   :  { %v1002_v18 = vrot.slane %v1327_v61, %v1828_v28 }
  0xf7   :  { %2930 = vst [vmem:[#allocation8_spill] sm:$0xff] %v2467_v29  ;;  %2936 = vst [vmem:[#allocation24_spill] sm:$0xff] %v2482_v40  ;;  %v754_v29 = vsel %vm113_vm4, %v2293_v50, %v2307_v39  ;;  %v761_v40 = vsel %vm22_vm5, %v759_v34, 0.0  ;;  %v797_v50 = vmul.f32 %v782_v1, %v2300_v31  ;;  %v1328_v31 = vld [vmem:[%s2813_s1 + $0x5] ss:$8 sm:$0xf] }
  0xf8   :  { %v2336_v13 = vpop.permute.xlu1 %917  ;;  %v2338_v38 = vpop.permute.xlu0 %915  ;;  %v798_v46 = vmul.f32 %v786_v37, %v754_v29  ;;  %v791_v34 = vmul.f32 %v774_v24, %v761_v40  ;;  %v2522_v29 = vmul.f32 %v1347_v9, %v1002_v18  ;;  %v867_v9 = vsel %vm223_vm7, %v2317_v16, %v2313_v12 }
  0xf9   :  { %2903 = vst [vmem:[#allocation13_spill] sm:$0xff] %v2338_v38  ;;  %v2480_v38 = vrot.slane %v1326_v33, %v1793_v47  ;;  %v866_v40 = vsel %vm223_vm7, %v2311_v7, %v2319_v25 }
  0xfb   :  { %2935 = vst [vmem:[#allocation23_spill] sm:$0xff] %v2480_v38  ;;  %v792_v38 = vmul.f32 %v778_v11, %v2291_v10 }
  0xfc   :  { %v2364_v26 = vpop.permute.xlu1 %929  ;;  %v2366_v60 = vpop.permute.xlu0 %927 }
  0xfd   :  { %2909 = vst [vmem:[#allocation2_spill] sm:$0xff] %v2366_v60 }
 0x100   :  { %v2417_v35 = vpop.permute.xlu1 %921  ;;  %v2419_v45 = vpop.permute.xlu0 %919 }
 0x101   :  { %2926 = vst [vmem:[#allocation6_spill] sm:$0xff] %v2417_v35  ;;  %2927 = vst [vmem:[#allocation18_spill] sm:$0xff] %v2419_v45  ;;  %v708_v45 = vadd.f32 %v1349_v41, %v700_v43  ;;  %v760_v35 = vsel %vm113_vm4, %v2307_v39, %v2267_v0  ;;  %v2477_v0 = vrot.slane %v1326_v33, %v1820_v57 }
 0x102   :  { %v765_v6 = vsel %vm22_vm5, %v760_v35, 0.0  ;;  %v793_v39 = vmul.f32 %v782_v1, %v2305_v19  ;;  %v2513_v35 = vrot.slane %v1326_v33, %v1828_v28  ;;  %v2518_v1 = vmul.f32 %v1342_v17, %v994_v63 }
 0x103   :  { %2934 = vst [vmem:[#allocation10_spill] sm:$0xff] %v2477_v0  ;;  %v796_v0 = vmul.f32 %v778_v11, %v2286_v58  ;;  %v998_v58 = vrot.slane %v1327_v61, %v1823_v62  ;;  %v2510_v11 = vrot.slane %v1326_v33, %v1823_v62  ;;  %v795_v19 = vmul.f32 %v774_v24, %v765_v6 }
 0x104   :  { %v2469_v43 = vpop.permute.xlu1 %925  ;;  %v2471_v60 = vpop.permute.xlu0 %923  ;;  %v800_v61 = vadd.f32 %v792_v38, %v706_v21  ;;  %v2527_v33 = vrot.slane %v1328_v31, %v1828_v28  ;;  %v806_v17 = vadd.f32 %v798_v46, %v712_v20  ;;  %v868_v38 = vsel %vm223_vm7, %v2315_v27, %v2311_v7  ;;  %v2941_v6 = vld [vmem:[#allocation2_spill] sm:$0xff]  ;;  %v2942_v7 = vld [vmem:[#allocation7_spill] sm:$0xff] }
 0x105   :  { %2931 = vst [vmem:[#allocation21_spill] sm:$0xff] %v2469_v43  ;;  %2932 = vst [vmem:[#allocation9_spill] sm:$0xff] %v2471_v60  ;;  %v753_v60 = vsel %vm113_vm4, %v2295_v3, %v2309_v23  ;;  %v2506_v23 = vmul.f32 %v1348_v8, %v990_v22  ;;  %v2520_v22 = vmul.f32 %v1343_v42, %v994_v63 }
 0x106   :  { %v794_v10 = vmul.f32 %v786_v37, %v753_v60  ;;  %v804_v8 = vadd.f32 %v796_v0, %v710_v36  ;;  %v2524_v60 = vmul.f32 %v1349_v41, %v1002_v18  ;;  %v805_v37 = vadd.f32 %v797_v50, %v711_v49 }
 0x107   :  { %2939 = vst [vmem:[#allocation27_spill] sm:$0xff] %v2506_v23  ;;  %v801_v23 = vadd.f32 %v793_v39, %v707_v30  ;;  %v2533_v24 = vmul.f32 %v1344_v32, %v998_v58  ;;  %v803_v41 = vadd.f32 %v795_v19, %v709_v59  ;;  %v799_v36 = vadd.f32 %v791_v34, %v705_v56 }
 0x108   :  { %v2502_v43 = vpop.permute.xlu1 %1025  ;;  %v2504_v3 = vpop.permute.xlu0 %1023  ;;  %v802_v42 = vadd.f32 %v794_v10, %v708_v45  ;;  %v2544_v21 = vrot.slane %v1328_v31, %v1820_v57  ;;  %v2547_v32 = vmul.f32 %v2432_v51, %v998_v58  ;;  %v842_v20 = vadd.f32 %v2353_v2, %v804_v8  ;;  %v2943_v58 = vld [vmem:[#allocation12_spill] sm:$0xff]  ;;  %v2945_v10 = vld [vmem:[#allocation19_spill] sm:$0xff] }
 0x109   :  { %2937 = vst [vmem:[#allocation25_spill] sm:$0xff] %v2502_v43  ;;  %2938 = vst [vmem:[#allocation26_spill] sm:$0xff] %v2504_v3  ;;  %v838_v45 = vadd.f32 %v2357_v55, %v800_v61  ;;  %v2552_v49 = vrot.slane %v1328_v31, %v1793_v47  ;;  %v2555_v30 = vrot.slane %v1328_v31, %v1823_v62  ;;  %v876_v59 = vsel %vm29_vm6, %v868_v38, 0.0  ;;  %v2948_v38 = vld [vmem:[#allocation8_spill] sm:$0xff] }
 0x10a   :  { %v872_v56 = vsel %vm29_vm6, %v867_v9, 0.0  ;;  %v843_v63 = vadd.f32 %v2360_v14, %v805_v37  ;;  %v839_v51 = vadd.f32 %v2369_v54, %v801_v23  ;;  %v844_v55 = vadd.f32 %v2372_v44, %v806_v17  ;;  %v2946_v17 = vld [vmem:[#allocation6_spill] sm:$0xff] }
 0x10b   :  { %v840_v0 = vadd.f32 %v2375_v48, %v802_v42  ;;  %v865_v14 = vsel %vm223_vm7, %v2313_v12, %v2321_v5  ;;  %v841_v54 = vadd.f32 %v2347_v4, %v803_v41  ;;  %v837_v18 = vadd.f32 %v2350_v15, %v799_v36  ;;  %v2940_v48 = vld [vmem:[#allocation13_spill] sm:$0xff]  ;;  %v2944_v4 = vld [vmem:[#allocation11_spill] sm:$0xff]  ;;  %v2947_v42 = vld [vmem:[#allocation18_spill] sm:$0xff] }
 0x10c   :  { %v2529_v3 = vpop.permute.xlu1 %1037  ;;  %v2531_v43 = vpop.permute.xlu0 %1035  ;;  %v938_v44 = vsel %vm113_vm4, %v2364_v26, %v2336_v13  ;;  %v937_v50 = vsel %vm113_vm4, %v2941_v6, %v2940_v48  ;;  %v906_v39 = vmul.f32 %v2942_v7, %v876_v59  ;;  %v902_v23 = vmul.f32 %v2942_v7, %v872_v56  ;;  %v2949_v36 = vld [vmem:[#allocation21_spill] sm:$0xff] }
 0x10d   :  { %v864_v12 = vsel %vm223_vm7, %v2319_v25, %v2943_v58  ;;  %v863_v15 = vsel %vm223_vm7, %v2321_v5, %v2944_v4  ;;  %v903_v31 = vmul.f32 %v2945_v10, %v866_v40  ;;  %v899_v19 = vmul.f32 %v2945_v10, %v865_v14 }
 0x10e   :  { %v862_v34 = vsel %vm223_vm7, %v2943_v58, %v2315_v27  ;;  %v861_v8 = vsel %vm223_vm7, %v2944_v4, %v2317_v16  ;;  %v943_v5 = vsel %vm22_vm5, %v938_v44, 0.0  ;;  %v939_v37 = vsel %vm22_vm5, %v937_v50, 0.0  ;;  %v2951_v44 = vld [vmem:[#allocation9_spill] sm:$0xff] }
 0x10f   :  { %v936_v27 = vsel %vm113_vm4, %v2336_v13, %v2946_v17  ;;  %v935_v16 = vsel %vm113_vm4, %v2940_v48, %v2947_v42  ;;  %v904_v9 = vmul.f32 %v2948_v38, %v864_v12  ;;  %v900_v41 = vmul.f32 %v2948_v38, %v863_v15  ;;  %v2950_v13 = vld [vmem:[#allocation22_spill] sm:$0xff]  ;;  %v2953_v12 = vld [vmem:[#allocation23_spill] sm:$0xff] }
 0x110   :  { %v2563_v46 = vpop.permute.xlu1 %1029  ;;  %v2565_v2 = vpop.permute.xlu0 %1027  ;;  %v932_v59 = vsel %vm113_vm4, %v2949_v36, %v2364_v26  ;;  %v934_v56 = vsel %vm113_vm4, %v2946_v17, %v2949_v36  ;;  %v905_v40 = vmul.f32 %v2950_v13, %v862_v34  ;;  %v901_v14 = vmul.f32 %v2950_v13, %v861_v8  ;;  %v2952_v26 = vld [vmem:[#allocation10_spill] sm:$0xff] }
 0x111   :  { %v931_v48 = vsel %vm113_vm4, %v2951_v44, %v2941_v6  ;;  %v933_v50 = vsel %vm113_vm4, %v2947_v42, %v2951_v44  ;;  %v973_v7 = vmul.f32 %v2952_v26, %v943_v5  ;;  %v969_v58 = vmul.f32 %v2952_v26, %v939_v37 }
 0x112   :  { %v974_v4 = vmul.f32 %v2953_v12, %v936_v27  ;;  %v970_v15 = vmul.f32 %v2953_v12, %v935_v16  ;;  %v911_v8 = vadd.f32 %v903_v31, %v841_v54  ;;  %v907_v17 = vadd.f32 %v899_v19, %v837_v18  ;;  %v1329_v27 = vld [vmem:[%s2813_s1 + $0x6] ss:$8 sm:$0xf] }
 0x113   :  { %v975_v6 = vmul.f32 %v2510_v11, %v934_v56  ;;  %v976_v38 = vmul.f32 %v2513_v35, %v932_v59  ;;  %v912_v36 = vadd.f32 %v904_v9, %v842_v20  ;;  %v908_v42 = vadd.f32 %v900_v41, %v838_v45 }
 0x114   :  { %v2607_v25 = vpop.permute.xlu1 %1033  ;;  %v2609_v61 = vpop.permute.xlu0 %1031  ;;  %v971_v5 = vmul.f32 %v2510_v11, %v933_v50  ;;  %v972_v37 = vmul.f32 %v2513_v35, %v931_v48  ;;  %v914_v16 = vadd.f32 %v906_v39, %v844_v55  ;;  %v910_v13 = vadd.f32 %v902_v23, %v840_v0  ;;  %v2661_v11 = vld [vmem:[%s2813_s1 + $0x20] ss:$8 sm:$0xf] }
 0x115   :  { %v913_v44 = vadd.f32 %v905_v40, %v843_v63  ;;  %v909_v26 = vadd.f32 %v901_v14, %v839_v51  ;;  %v981_v54 = vadd.f32 %v973_v7, %v911_v8  ;;  %v977_v18 = vadd.f32 %v969_v58, %v907_v17  ;;  %v2954_v51 = vld [vmem:[#allocation25_spill] sm:$0xff]  ;;  %v2955_v23 = vld [vmem:[#allocation26_spill] sm:$0xff]  ;;  %v2956_v50 = vld [vmem:[#allocation24_spill] sm:$0xff] }
 0x116   :  { %v982_v31 = vadd.f32 %v974_v4, %v912_v36  ;;  %v978_v19 = vadd.f32 %v970_v15, %v908_v42  ;;  %v984_v20 = vadd.f32 %v976_v38, %v914_v16  ;;  %v1154_v45 = vrot.slane %v1329_v27, %v1820_v57  ;;  %v2957_v58 = vld [vmem:[#allocation27_spill] sm:$0xff] }
 0x117   :  { %v983_v35 = vadd.f32 %v975_v6, %v913_v44  ;;  %v1158_v55 = vrot.slane %v1329_v27, %v1793_v47  ;;  %v979_v0 = vadd.f32 %v971_v5, %v909_v26  ;;  %v980_v63 = vadd.f32 %v972_v37, %v910_v13 }
 0x118   :  { %v2647_v10 = vpop.permute.xlu1 %1119  ;;  %v2649_v34 = vpop.permute.xlu0 %1117  ;;  %v1046_v39 = vsel %vm223_vm7, %v2529_v3, %v2954_v51  ;;  %v1045_v9 = vsel %vm223_vm7, %v2531_v43, %v2955_v23  ;;  %v1162_v41 = vrot.slane %v1329_v27, %v1823_v62  ;;  %v1166_v40 = vrot.slane %v1329_v27, %v1828_v28 }
 0x119   :  { %v2677_v14 = vrot.slane %v2661_v11, %v1828_v28  ;;  %v2681_v48 = vrot.slane %v2661_v11, %v1820_v57  ;;  %v1019_v7 = vadd.f32 %v2956_v50, %v981_v54  ;;  %v1015_v12 = vadd.f32 %v2957_v58, %v977_v18 }
 0x11a   :  { %v1020_v4 = vadd.f32 %v2518_v1, %v982_v31  ;;  %v1016_v15 = vadd.f32 %v2520_v22, %v978_v19  ;;  %v1054_v6 = vsel %vm29_vm6, %v1046_v39, 0.0  ;;  %v1050_v28 = vsel %vm29_vm6, %v1045_v9, 0.0 }
 0x11b   :  { %v1044_v57 = vsel %vm223_vm7, %v2954_v51, %v2563_v46  ;;  %v1043_v1 = vsel %vm223_vm7, %v2955_v23, %v2565_v2  ;;  %v1022_v22 = vadd.f32 %v2522_v29, %v984_v20  ;;  %v1018_v38 = vadd.f32 %v2524_v60, %v980_v63 }
 0x11c   :  { %v1132_v56 = vpop.permute.xlu1 %1131  ;;  %v1130_v59 = vpop.permute.xlu0 %1129  ;;  %v1021_v36 = vadd.f32 %v2533_v24, %v983_v35  ;;  %v1017_v42 = vadd.f32 %v2547_v32, %v979_v0  ;;  %v1040_v5 = vsel %vm223_vm7, %v2607_v25, %v2529_v3  ;;  %v1042_v37 = vsel %vm223_vm7, %v2563_v46, %v2607_v25 }
 0x11d   :  { %v1140_v29 = vsel %vm113_vm4, %v1132_v56, %v2647_v10  ;;  %v1139_v60 = vsel %vm113_vm4, %v1130_v59, %v2649_v34  ;;  %v1084_v24 = vmul.f32 %v2527_v33, %v1054_v6  ;;  %v1080_v32 = vmul.f32 %v2527_v33, %v1050_v28 }
 0x11e   :  { %v1081_v27 = vmul.f32 %v2544_v21, %v1044_v57  ;;  %v1077_v3 = vmul.f32 %v2544_v21, %v1043_v1  ;;  %v1039_v46 = vsel %vm223_vm7, %v2609_v61, %v2531_v43  ;;  %v1041_v25 = vsel %vm223_vm7, %v2565_v2, %v2609_v61 }
 0x11f   :  { %v1082_v21 = vmul.f32 %v2552_v49, %v1042_v37  ;;  %v1083_v26 = vmul.f32 %v2555_v30, %v1040_v5  ;;  %v1145_v54 = vsel %vm22_vm5, %v1140_v29, 0.0  ;;  %v1141_v43 = vsel %vm22_vm5, %v1139_v60, 0.0 }
 0x120   :  { %v1124_v8 = vpop.permute.xlu1 %1123  ;;  %v1122_v17 = vpop.permute.xlu0 %1121  ;;  %v1092_v19 = vadd.f32 %v1084_v24, %v1022_v22  ;;  %v1079_v35 = vmul.f32 %v2555_v30, %v1039_v46  ;;  %v1175_v63 = vmul.f32 %v1154_v45, %v1145_v54  ;;  %v1171_v51 = vmul.f32 %v1154_v45, %v1141_v43 }
 0x121   :  { %v1138_v2 = vsel %vm113_vm4, %v2647_v10, %v1124_v8  ;;  %v1137_v61 = vsel %vm113_vm4, %v2649_v34, %v1122_v17  ;;  %v1089_v23 = vadd.f32 %v1081_v27, %v1019_v7  ;;  %v1085_v34 = vadd.f32 %v1077_v3, %v1015_v12 }
 0x122   :  { %v1176_v9 = vmul.f32 %v1158_v55, %v1138_v2  ;;  %v1090_v50 = vadd.f32 %v1082_v21, %v1020_v4  ;;  %v1091_v58 = vadd.f32 %v1083_v26, %v1021_v36  ;;  %v1087_v30 = vadd.f32 %v1079_v35, %v1017_v42  ;;  %v2959_v36 = vld [vmem:[#allocation4_spill] sm:$0xff]  ;;  %v2961_v21 = vld [vmem:[#allocation3_spill] sm:$0xff] }
 0x123   :  { %v1179_v5 = vadd.f32 %v1171_v51, %v1085_v34  ;;  %v1266_v3 = vrot.slane %v2661_v11, %v1793_v47  ;;  %v2962_v47 = vld [vmem:[#allocation15_spill] sm:$0xff] }
 0x124   :  { %v1128_v16 = vpop.permute.xlu1 %1127  ;;  %v1126_v13 = vpop.permute.xlu0 %1125  ;;  %v1184_v12 = vadd.f32 %v1176_v9, %v1090_v50 }
 0x125   :  { %v1134_v44 = vsel %vm113_vm4, %v1128_v16, %v1132_v56  ;;  %v1133_v33 = vsel %vm113_vm4, %v1126_v13, %v1130_v59  ;;  %v1088_v56 = vadd.f32 %v1080_v32, %v1018_v38  ;;  %v1078_v59 = vmul.f32 %v2552_v49, %v1041_v25 }
 0x126   :  { %v1178_v18 = vmul.f32 %v1166_v40, %v1134_v44  ;;  %v1174_v31 = vmul.f32 %v1166_v40, %v1133_v33  ;;  %v1136_v39 = vsel %vm113_vm4, %v1124_v8, %v1128_v16  ;;  %v1135_v10 = vsel %vm113_vm4, %v1122_v17, %v1126_v13  ;;  %v2958_v17 = vld [vmem:[#allocation20_spill] sm:$0xff]  ;;  %v2960_v44 = vld [vmem:[#allocation14_spill] sm:$0xff] }
 0x127   :  { %v1172_v40 = vmul.f32 %v1158_v55, %v1137_v61  ;;  %v1086_v28 = vadd.f32 %v1078_v59, %v1016_v15  ;;  %v1177_v57 = vmul.f32 %v1162_v41, %v1136_v39  ;;  %v1173_v1 = vmul.f32 %v1162_v41, %v1135_v10 }
 0x128   :  { %v1228_v20 = vpop.permute.xlu1 %1227  ;;  %v1226_v0 = vpop.permute.xlu0 %1225  ;;  %v1186_v6 = vadd.f32 %v1178_v18, %v1092_v19  ;;  %v1182_v49 = vadd.f32 %v1174_v31, %v1088_v56  ;;  %v1183_v38 = vadd.f32 %v1175_v63, %v1089_v23  ;;  %v1270_v16 = vrot.slane %v2661_v11, %v1823_v62  ;;  %v2963_v11 = vld [vmem:[#allocation16_spill] sm:$0xff]  ;;  %v2964_v18 = vld [vmem:[#allocation5_spill] sm:$0xff] }
 0x129   :  { %v1180_v55 = vadd.f32 %v1172_v40, %v1086_v28  ;;  %v1185_v60 = vadd.f32 %v1177_v57, %v1091_v58  ;;  %v1181_v24 = vadd.f32 %v1173_v1, %v1087_v30  ;;  %v1217_v26 = vadd.f32 %v2961_v21, %v1179_v5  ;;  %v2965_v56 = vld [vmem:[#allocation17_spill] sm:$0xff] }
 0x12a   :  { %v1224_v41 = vadd.f32 %v2958_v17, %v1186_v6  ;;  %v1220_v42 = vadd.f32 %v2959_v36, %v1182_v49  ;;  %v1222_v62 = vadd.f32 %v2962_v47, %v1184_v12 }
 0x12b   :  { %v1218_v43 = vadd.f32 %v2963_v11, %v1180_v55  ;;  %v1223_v31 = vadd.f32 %v2964_v18, %v1185_v60  ;;  %v1219_v59 = vadd.f32 %v2965_v56, %v1181_v24 }
 0x12c   :  { %v1240_v22 = vpop.permute.xlu1 %1239  ;;  %v1238_v45 = vpop.permute.xlu0 %1237 }
 0x12d   :  { %v1248_v8 = vsel %vm223_vm7, %v1240_v22, %v1228_v20  ;;  %v1247_v7 = vsel %vm223_vm7, %v1238_v45, %v1226_v0 }
 0x12e   :  { %v1256_v4 = vsel %vm29_vm6, %v1248_v8, 0.0  ;;  %v1252_v15 = vsel %vm29_vm6, %v1247_v7, 0.0 }
 0x12f   :  { %v1286_v37 = vmul.f32 %v2677_v14, %v1256_v4  ;;  %v1282_v29 = vmul.f32 %v2677_v14, %v1252_v15  ;;  %v1221_v14 = vadd.f32 %v2960_v44, %v1183_v38 }
 0x130   :  { %v1232_v32 = vpop.permute.xlu1 %1231  ;;  %v1230_v27 = vpop.permute.xlu0 %1229 }
 0x131   :  { %v1294_v52 = vadd.f32 %v1286_v37, %v1224_v41  ;;  %v1290_v13 = vadd.f32 %v1282_v29, %v1220_v42  ;;  %v1246_v46 = vsel %vm223_vm7, %v1228_v20, %v1232_v32  ;;  %v1245_v25 = vsel %vm223_vm7, %v1226_v0, %v1230_v27 }
 0x132   :  { %v1283_v33 = vmul.f32 %v2681_v48, %v1246_v46  ;;  %v1279_v54 = vmul.f32 %v2681_v48, %v1245_v25 }
 0x133   :  { %1339 = vst [vmem:[%s2814_s3 + $0x78] sm:$0xff] %v1294_v52  ;;  %1335 = vst [vmem:[%s2814_s3 + $0x58] sm:$0xff] %v1290_v13 }
 0x134   :  { %v1291_v2 = vadd.f32 %v1283_v33, %v1221_v14  ;;  %v1287_v61 = vadd.f32 %v1279_v54, %v1217_v26  ;;  %v1236_v19 = vpop.permute.xlu1 %1235  ;;  %v1234_v48 = vpop.permute.xlu0 %1233 }
 0x135   :  { %v1242_v35 = vsel %vm223_vm7, %v1236_v19, %v1240_v22  ;;  %v1244_v20 = vsel %vm223_vm7, %v1232_v32, %v1236_v19  ;;  %v1241_v0 = vsel %vm223_vm7, %v1234_v48, %v1238_v45  ;;  %v1243_v63 = vsel %vm223_vm7, %v1230_v27, %v1234_v48 }
 0x136   :  { %1336 = vst [vmem:[%s2814_s3 + $0x60] sm:$0xff] %v1291_v2  ;;  %1332 = vst [vmem:[%s2814_s3 + $0x40] sm:$0xff] %v1287_v61  ;;  %v1284_v51 = vmul.f32 %v1266_v3, %v1244_v20  ;;  %v1285_v39 = vmul.f32 %v1270_v16, %v1242_v35  ;;  %v1280_v10 = vmul.f32 %v1266_v3, %v1243_v63 }
 0x137   :  { %v1281_v23 = vmul.f32 %v1270_v16, %v1241_v0 }
 0x138   :  { %v1292_v34 = vadd.f32 %v1284_v51, %v1222_v62  ;;  %v1293_v9 = vadd.f32 %v1285_v39, %v1223_v31  ;;  %v1288_v40 = vadd.f32 %v1280_v10, %v1218_v43 }
 0x139   :  { %v1289_v50 = vadd.f32 %v1281_v23, %v1219_v59 }
 0x13a   :  { %1337 = vst [vmem:[%s2814_s3 + $0x68] sm:$0xff] %v1292_v34  ;;  %1338 = vst [vmem:[%s2814_s3 + $0x70] sm:$0xff] %v1293_v9 }
 0x13b   :  { %1333 = vst [vmem:[%s2814_s3 + $0x48] sm:$0xff] %v1288_v40  ;;  %1334 = vst [vmem:[%s2814_s3 + $0x50] sm:$0xff] %v1289_v50 }

</bundles_post_ra>
